<compile_context>
chip_gen: v5e
topology: v5e:2x2
jax: 0.10.0
libtpu: 0.0.40
codegen_flags: <defaults>
</compile_context>

<pallas_src>
from functools import partial

import jax
import jax.numpy as jnp
from jax.experimental import pallas as pl
from jax.experimental.pallas import tpu as pltpu


def conv_bn_relu_kernel(x_ref, w_ref, shift_ref, o_ref, *, W, Wp, Cin, KH, KW, BR):
    """One (batch, row-block, cout-tile) grid step.

    x_ref:     (1, Hp, Wp*Cin)   f32 padded image, (W, Cin) fused in lanes
    w_ref:     (KH*KW*Cin, TCO)  bf16 BN-scale-folded weight slab
    shift_ref: (1, TCO)          f32 folded BN shift
    o_ref:     (1, BR*W, TCO)    f32 lane-dense output tile
    """
    row0 = pl.program_id(1) * BR  # first output row of this block

    # Build the im2col patch for BR output rows x W output columns.
    pieces = []
    for kh in range(KH):
        rows = x_ref[0, pl.ds(row0 + kh, BR), :]       # (BR, Wp*Cin)
        rows = rows.reshape(BR, Wp, Cin)
        for kw in range(KW):
            pieces.append(rows[:, kw:kw + W, :])        # (BR, W, Cin)
    patch = jnp.concatenate(pieces, axis=-1)            # (BR, W, KH*KW*Cin)
    patch = patch.reshape(BR * W, KH * KW * Cin)

    # Single MXU matmul: bf16 inputs, f32 accumulation.
    acc = jnp.dot(patch.astype(w_ref.dtype), w_ref[...],
                  preferred_element_type=jnp.float32)   # (BR*W, TCO)

    # Folded-BN shift + ReLU epilogue in f32, single lane-dense store.
    y = jnp.maximum(acc + shift_ref[...], 0.0)
    o_ref[...] = y.reshape(o_ref.shape).astype(o_ref.dtype)


def convbnrelu_forward(x_nchw, w_oihw, gamma, beta, running_mean, running_var,
                       *, stride=1, pad=1, dilation=1, groups=1, eps=1e-5):
    """Matches convbnrelu(in_ch, out_ch, k=3, s=1, p=1, bias=False, bn=True,
    relu=True) in inference mode (BN uses running statistics)."""
    assert stride == 1 and dilation == 1 and groups == 1, "module defaults only"
    N, Cin, H, W = x_nchw.shape
    Cout, Cin_w, KH, KW = w_oihw.shape
    assert Cin_w == Cin
    assert 2 * pad == KH - 1 and 2 * pad == KW - 1, "same-size output expected"

    Hp, Wp = H + 2 * pad, W + 2 * pad

    # ---- glue (plain JAX): layout change, padding, BN folding ----
    # x: NCHW -> padded (N, Hp, Wp*Cin); lane axis = fused (W, Cin).
    x = jnp.transpose(x_nchw, (0, 2, 3, 1)).astype(jnp.float32)        # NHWC
    x = jnp.pad(x, ((0, 0), (pad, pad), (pad, pad), (0, 0)))
    x = x.reshape(N, Hp, Wp * Cin)

    # Fold BN scale into the conv weights; keep shift as a per-channel add.
    scale = (gamma / jnp.sqrt(running_var + eps)).astype(jnp.float32)  # (Cout,)
    shift = (beta - running_mean * scale).astype(jnp.float32)          # (Cout,)

    # Weight slab (KH*KW*Cin, Cout_pad); row index = (kh*KW + kw)*Cin + c.
    w = jnp.transpose(w_oihw, (2, 3, 1, 0)).astype(jnp.float32)        # KH,KW,Cin,Cout
    w = (w * scale).reshape(KH * KW * Cin, Cout)

    # Pad Cout to a multiple of 128 -> lane-dense matmul output and stores.
    Cout_pad = ((Cout + 127) // 128) * 128
    TCO = 128
    w = jnp.pad(w, ((0, 0), (0, Cout_pad - Cout))).astype(jnp.bfloat16)
    shift = jnp.pad(shift, (0, Cout_pad - Cout)).reshape(1, Cout_pad)

    # Row-block size: BR output rows per grid step (BR*W rows feed the MXU).
    BR = next(b for b in (8, 4, 2, 1) if H % b == 0)

    kern = partial(conv_bn_relu_kernel, W=W, Wp=Wp, Cin=Cin, KH=KH, KW=KW, BR=BR)

    grid = (N, H // BR, Cout_pad // TCO)
    out = pl.pallas_call(
        kern,
        out_shape=jax.ShapeDtypeStruct((N, H * W, Cout_pad), jnp.float32),
        grid=grid,
        in_specs=[
            # Full padded image per batch element: index depends only on n, so
            # it is fetched once per n and reused across all row/Cout steps.
            pl.BlockSpec((1, Hp, Wp * Cin), lambda n, r, co: (n, 0, 0)),
            pl.BlockSpec((KH * KW * Cin, TCO), lambda n, r, co: (0, co)),
            pl.BlockSpec((1, TCO), lambda n, r, co: (0, co)),
        ],
        out_specs=pl.BlockSpec((1, BR * W, TCO), lambda n, r, co: (n, r, co)),
        compiler_params=pltpu.CompilerParams(
            dimension_semantics=("parallel", "parallel", "parallel")),
    )(x, w, shift)

    out = out.reshape(N, H, W, Cout_pad)[:, :, :, :Cout]
    return jnp.transpose(out, (0, 3, 1, 2))  # back to NCHW


def _reference(x_nchw, w_oihw, gamma, beta, running_mean, running_var, eps=1e-5):
    y = jax.lax.conv_general_dilated(
        x_nchw.astype(jnp.float32), w_oihw.astype(jnp.float32),
        window_strides=(1, 1), padding=((1, 1), (1, 1)),
        dimension_numbers=("NCHW", "OIHW", "NCHW"))
    scale = gamma / jnp.sqrt(running_var + eps)
    shift = beta - running_mean * scale
    y = y * scale[None, :, None, None] + shift[None, :, None, None]
    return jnp.maximum(y, 0.0)


if __name__ == "__main__":
    key = jax.random.PRNGKey(0)
    k_x, k_w, k_g, k_b, k_m, k_v = jax.random.split(key, 6)

    N, Cin, Cout, H, W, K = 2, 4, 8, 16, 16, 3

    x = jax.random.normal(k_x, (N, Cin, H, W), dtype=jnp.float32)
    w = jax.random.normal(k_w, (Cout, Cin, K, K), dtype=jnp.float32) * 0.1
    gamma = 1.0 + 0.1 * jax.random.normal(k_g, (Cout,), dtype=jnp.float32)
    beta = 0.1 * jax.random.normal(k_b, (Cout,), dtype=jnp.float32)
    running_mean = 0.1 * jax.random.normal(k_m, (Cout,), dtype=jnp.float32)
    running_var = 1.0 + 0.1 * jnp.abs(jax.random.normal(k_v, (Cout,), dtype=jnp.float32))

    out = convbnrelu_forward(x, w, gamma, beta, running_mean, running_var)
    out = jax.block_until_ready(out)

    ref = _reference(x, w, gamma, beta, running_mean, running_var)
    assert out.shape == (N, Cout, H, W)
    err = float(jnp.max(jnp.abs(out - ref)))
    # bf16 MXU inputs (f32 accumulation) vs a pure-f32 reference.
    assert err < 5e-2, f"max abs err {err}"

    print("KERNEL_OK")
</pallas_src>

<mosaic_0001>
module attributes {stable_mosaic.version = 11 : i64} {
  func.func @conv_bn_relu_kernel(%arg0: i32, %arg1: i32, %arg2: i32, %arg3: memref<1x18x72xf32, #tpu.memory_space<vmem>>, %arg4: memref<36x128xbf16, #tpu.memory_space<vmem>>, %arg5: memref<1x128xf32, #tpu.memory_space<vmem>>, %arg6: memref<1x128x128xf32, #tpu.memory_space<vmem>>) attributes {dimension_semantics = [#tpu.dimension_semantics<parallel>, #tpu.dimension_semantics<parallel>, #tpu.dimension_semantics<parallel>], iteration_bounds = array<i64: 2, 2, 1>, scalar_prefetch = 0 : i64, scratch_operands = 0 : i64, tpu.core_type = #tpu.core_type<tc>, window_params = [{transform_indices = @transform_0, window_bounds = array<i64: 1, 18, 72>}, {transform_indices = @transform_1, window_bounds = array<i64: 36, 128>}, {transform_indices = @transform_2, window_bounds = array<i64: 1, 128>}, {transform_indices = @transform_3, window_bounds = array<i64: 1, 128, 128>}]} {
    %c8_i32 = arith.constant 8 : i32
    %0 = arith.muli %arg1, %c8_i32 : i32
    %c0_i32 = arith.constant 0 : i32
    %1 = arith.addi %0, %c0_i32 : i32
    %c0 = arith.constant 0 : index
    %2 = arith.index_cast %1 : i32 to index
    %c0_0 = arith.constant 0 : index
    %3 = vector.load %arg3[%c0, %2, %c0_0] : memref<1x18x72xf32, #tpu.memory_space<vmem>>, vector<1x8x72xf32>
    %4 = vector.shape_cast %3 : vector<1x8x72xf32> to vector<8x72xf32>
    %5 = vector.shape_cast %4 : vector<8x72xf32> to vector<8x18x4xf32>
    %6 = vector.extract_strided_slice %5 {offsets = [0, 0, 0], sizes = [8, 16, 4], strides = [1, 1, 1]} : vector<8x18x4xf32> to vector<8x16x4xf32>
    %7 = vector.extract_strided_slice %5 {offsets = [0, 1, 0], sizes = [8, 16, 4], strides = [1, 1, 1]} : vector<8x18x4xf32> to vector<8x16x4xf32>
    %8 = vector.extract_strided_slice %5 {offsets = [0, 2, 0], sizes = [8, 16, 4], strides = [1, 1, 1]} : vector<8x18x4xf32> to vector<8x16x4xf32>
    %c1_i32 = arith.constant 1 : i32
    %9 = arith.addi %0, %c1_i32 : i32
    %c0_1 = arith.constant 0 : index
    %10 = arith.index_cast %9 : i32 to index
    %c0_2 = arith.constant 0 : index
    %11 = vector.load %arg3[%c0_1, %10, %c0_2] : memref<1x18x72xf32, #tpu.memory_space<vmem>>, vector<1x8x72xf32>
    %12 = vector.shape_cast %11 : vector<1x8x72xf32> to vector<8x72xf32>
    %13 = vector.shape_cast %12 : vector<8x72xf32> to vector<8x18x4xf32>
    %14 = vector.extract_strided_slice %13 {offsets = [0, 0, 0], sizes = [8, 16, 4], strides = [1, 1, 1]} : vector<8x18x4xf32> to vector<8x16x4xf32>
    %15 = vector.extract_strided_slice %13 {offsets = [0, 1, 0], sizes = [8, 16, 4], strides = [1, 1, 1]} : vector<8x18x4xf32> to vector<8x16x4xf32>
    %16 = vector.extract_strided_slice %13 {offsets = [0, 2, 0], sizes = [8, 16, 4], strides = [1, 1, 1]} : vector<8x18x4xf32> to vector<8x16x4xf32>
    %c2_i32 = arith.constant 2 : i32
    %17 = arith.addi %0, %c2_i32 : i32
    %c0_3 = arith.constant 0 : index
    %18 = arith.index_cast %17 : i32 to index
    %c0_4 = arith.constant 0 : index
    %19 = vector.load %arg3[%c0_3, %18, %c0_4] : memref<1x18x72xf32, #tpu.memory_space<vmem>>, vector<1x8x72xf32>
    %20 = vector.shape_cast %19 : vector<1x8x72xf32> to vector<8x72xf32>
    %21 = vector.shape_cast %20 : vector<8x72xf32> to vector<8x18x4xf32>
    %22 = vector.extract_strided_slice %21 {offsets = [0, 0, 0], sizes = [8, 16, 4], strides = [1, 1, 1]} : vector<8x18x4xf32> to vector<8x16x4xf32>
    %23 = vector.extract_strided_slice %21 {offsets = [0, 1, 0], sizes = [8, 16, 4], strides = [1, 1, 1]} : vector<8x18x4xf32> to vector<8x16x4xf32>
    %24 = vector.extract_strided_slice %21 {offsets = [0, 2, 0], sizes = [8, 16, 4], strides = [1, 1, 1]} : vector<8x18x4xf32> to vector<8x16x4xf32>
    %25 = tpu.concatenate %6, %7, %8, %14, %15, %16, %22, %23, %24 in 2 : vector<8x16x4xf32>, vector<8x16x4xf32>, vector<8x16x4xf32>, vector<8x16x4xf32>, vector<8x16x4xf32>, vector<8x16x4xf32>, vector<8x16x4xf32>, vector<8x16x4xf32>, vector<8x16x4xf32> -> vector<8x16x36xf32>
    %26 = vector.shape_cast %25 : vector<8x16x36xf32> to vector<128x36xf32>
    %27 = arith.truncf %26 : vector<128x36xf32> to vector<128x36xbf16>
    %c0_5 = arith.constant 0 : index
    %c0_6 = arith.constant 0 : index
    %28 = vector.load %arg4[%c0_5, %c0_6] : memref<36x128xbf16, #tpu.memory_space<vmem>>, vector<36x128xbf16>
    %cst = arith.constant dense<0.000000e+00> : vector<128x128xf32>
    %29 = tpu.matmul %27, %28, %cst {dimension_numbers = #tpu.dot_dimension_numbers<[1], [0], [0], [1], [0, 0, 1, 1], [], []>} : vector<128x36xbf16>, vector<36x128xbf16>, vector<128x128xf32> -> vector<128x128xf32>
    %c0_7 = arith.constant 0 : index
    %c0_8 = arith.constant 0 : index
    %30 = vector.load %arg5[%c0_7, %c0_8] : memref<1x128xf32, #tpu.memory_space<vmem>>, vector<1x128xf32>
    %31 = vector.broadcast %30 : vector<1x128xf32> to vector<128x128xf32>
    %32 = arith.addf %29, %31 : vector<128x128xf32>
    %cst_9 = arith.constant 0.000000e+00 : f32
    %33 = vector.broadcast %cst_9 : f32 to vector<128x128xf32>
    %34 = arith.maximumf %32, %33 : vector<128x128xf32>
    %35 = vector.shape_cast %34 : vector<128x128xf32> to vector<1x128x128xf32>
    %c0_10 = arith.constant 0 : index
    %c0_11 = arith.constant 0 : index
    %c0_12 = arith.constant 0 : index
    %36 = vector.load %arg6[%c0_10, %c0_11, %c0_12] : memref<1x128x128xf32, #tpu.memory_space<vmem>>, vector<1x128x128xf32>
    tpu.vector_store %arg6[%c0_10, %c0_11, %c0_12], %35 {strides = array<i32>} : memref<1x128x128xf32, #tpu.memory_space<vmem>>, vector<1x128x128xf32>,
    return
  }
  func.func @transform_0(%arg0: i32, %arg1: i32, %arg2: i32) -> (i32, i32, i32) {
    %c0_i32 = arith.constant 0 : i32
    %c0_i32_0 = arith.constant 0 : i32
    %c0_i32_1 = arith.constant 0 : i32
    return %arg0, %c0_i32, %c0_i32_0 : i32, i32, i32
  }
  func.func @transform_1(%arg0: i32, %arg1: i32, %arg2: i32) -> (i32, i32) {
    %c0_i32 = arith.constant 0 : i32
    %c0_i32_0 = arith.constant 0 : i32
    return %c0_i32, %arg2 : i32, i32
  }
  func.func @transform_2(%arg0: i32, %arg1: i32, %arg2: i32) -> (i32, i32) {
    %c0_i32 = arith.constant 0 : i32
    %c0_i32_0 = arith.constant 0 : i32
    return %c0_i32, %arg2 : i32, i32
  }
  func.func @transform_3(%arg0: i32, %arg1: i32, %arg2: i32) -> (i32, i32, i32) {
    %c0_i32 = arith.constant 0 : i32
    return %arg0, %arg1, %arg2 : i32, i32, i32
  }
}

</mosaic_0001>

<bundles_post_ra>
// kernel: tpu_custom_call.1
= control target key start
LH: loop header
LB: loop body
LE: loop exit
PB: predicated region body
PF: predicated region fallthrough
CT: control target
= control target key end

     0   :  { %s5002_s0 = inlined_call_operand.vmem [shape: f32[2,18,72], index: 0, kind: input, shape index: {}]   ;;  %s5003_s1 = inlined_call_operand.vmem [shape: bf16[36,128], index: 1, kind: input, shape index: {}]   ;;  %s5004_s2 = inlined_call_operand.vmem [shape: f32[1,128], index: 2, kind: input, shape index: {}]   ;;  %s5005_s3 = inlined_call_operand.hbm [shape: f32[2,256,128], index: 3, kind: output, shape index: {}]  }
   0x1   :  { %5043 = sst [smem:[#allocation33_spill]] %s5002_s0 }
   0x2   :  { %8 = vsyncpa [#allocation3], 0 }
   0x3   :  { %10 = vsyncpa [#allocation3 + $0x1], 0  ;;  %s3026_s12 = smov 0   ;;  %s3028_s13 = smov 0  }
   0x4   :  { %s3030_s14 = smov 0   ;;  %s3032_s15 = smov 0  }
   0x5   :  { %s3034_s16 = smov 0   ;;  %s3036_s17 = smov 0  }
   0x6   :  { %s3038_s18 = smov 0   ;;  %s3040_s19 = smov 0  }
   0x7 LB: > { %s2329_s20 = sadd.s32 4294967295, %s2976_s19   ;;  %s2330_s21 = sadd.s32 4294967294, %s2976_s19   ;;  %s2976_s19 = sphi %s3040_s19, %s16_s19   ;;  %s2972_s18 = sphi %s3038_s18, %s5162_s18   ;;  %s2968_s17 = sphi %s3036_s17, %s5161_s17   ;;  %s2964_s16 = sphi %s3034_s16, %s5160_s16   ;;  %s2960_s15 = sphi %s3032_s15, %s5159_s15   ;;  %s2956_s14 = sphi %s3030_s14, %s5158_s14   ;;  %s2952_s13 = sphi %s3028_s13, %s5157_s13   ;;  %s2948_s12 = sphi %s3026_s12, %s5156_s12  }
   0x8   : > { %s31_s22 = sadd.s32 1, %s2968_s17  ;;  %s35_s23 = sadd.s32 1, %s2972_s18 }
   0x9   : > { %p33_p0 = scmp.ge.s32.totalorder %s31_s22, 2  ;;  %p134_p1 = scmp.ne.s32.totalorder %s2956_s14, %s2952_s13 }
   0xa   : > { %p135_p2 = scmp.eq.s32.totalorder %s2329_s20, 3  ;;  %p140_p5 = scmp.ne.s32.totalorder %s2952_s13, %s2948_s12 }
   0xb   : > { %s5164_s22 = smov (%p33_p0, %s31_s22), 0  ;;  %s5166_s23 = smov (!%p33_p0, %s35_s23), %s2972_s18 }
   0xc   : > { %5044 = sst [smem:[#allocation5_spill]] %s5164_s22  ;;  %s118_s24 = ssub.s32 %s2968_s17, %s5164_s22 }
   0xd   : > { %p3077_p3 = por %p135_p2, %p134_p1  ;;  %p37_p4 = scmp.ge.s32.totalorder %s5166_s23, 2 }
   0xe   : > { %p141_p6 = scmp.eq.s32.totalorder %s2330_s21, 3  ;;  %p2335_p7 = scmp.ge.s32.totalorder %s2976_s19, 1 }
   0xf   : > { %s5168_s23 = smov (%p37_p4, %s5166_s23), 0  ;;  %p180_p9 = scmp.lt.s32.totalorder %s2976_s19, 5 }
  0x10   : > { %5046 = sst [smem:[#allocation6_spill]] %s5168_s23  ;;  %p3086_p8 = por %p141_p6, %p140_p5 }
  0x11   : > { %s117_s27 = ssub.s32 %s2972_s18, %s5168_s23  ;;  %s124_s28 = sadd.s32 1, %s2956_s14 }
  0x12   : > { %s119_s29 = sor.u32 %s118_s24, %s117_s27  ;;  %p181_p10 = pnand %p2335_p7, %p180_p9 }
  0x13   : > { %p122_p11 = scmp.eq.s32.totalorder %s119_s29, 0 }
  0x14   : > { %184 = sbr.rel (%p181_p10) target bundleno = 674 (0x2a2), region = 32 }
  0x15   : > { %s3095_s30 = scalar_select %p122_p11, %s2956_s14, %s124_s28  }
  0x19   : > { %p211_p12 = scmp.lt.s32.totalorder %s2964_s16, 1  ;;  %s2338_s6 = sshll.u32 %s2960_s15, 3  ;;  %vm281_vm0 = vcmask 1047556   ;;  %v2995_v18 = vmov 1983009808   ;;  %vm1243_vm1 = vcmask 1046528  }
  0x1a   : > { %s5048_s0 = sld [smem:[#allocation33_spill]]  ;;  %s2978_s11 = smov 116   ;;  %v286_v19 = vunpack.c.l.s4 %v2995_v18  ;;  %v2996_v36 = vmov 1934713408   ;;  %vm1332_vm2 = vcmask 1045504   ;;  %vm1917_vm3 = vcmask 31744  }
  0x1b   : > { %s212_s4 = scalar_select %p211_p12, %s2964_s16, 1  ;;  %v334_v37 = vunpack.c.l.s4 %v2996_v36  ;;  %vm1934_vm4 = vcmask 64512   ;;  %vm1951_vm5 = vcmask 97280   ;;  %vm1968_vm6 = vcmask 130048  }
  0x1c   : > { %s2979_s20 = smov 124   ;;  %s5006_s21 = smov 108   ;;  %v3162_v27 = vunpack.c.0.s8 %v286_v19  ;;  %vm2110_vm7 = vcmask 1041408   ;;  %vm1985_vm8 = vcmask 162816   ;;  %vm2002_vm9 = vcmask 195584  }
  0x1d   : > { %s2376_s5 = smul.u32 24, %s212_s4  ;;  %s5007_s24 = smov 112   ;;  %v3197_v54 = vunpack.c.0.s8 %v334_v37  ;;  %vm2019_vm10 = vcmask 228352   ;;  %vm2036_vm11 = vcmask 261120   ;;  %vm2085_vm12 = vcmask 293888  }
  0x1e   : > { %s2982_s27 = smov 120   ;;  %s5008_s28 = smov 104  }
  0x1f   : > { %s5009_s29 = smov 96   ;;  %s2985_s4 = smov 100  }
  0x20   : > { %s215_s9 = scalar_lea.vmem %s5048_s0, %s2376_s5  ;;  %s2986_s5 = smov 92  }
  0x21   : > { %s3103_s10 = scalar_lea.vmem %s215_s9, %s2338_s6  ;;  %s2987_s6 = smov 84  }
  0x22   : > { %v3106_v0 = vld [vmem:[%s3103_s10] sm:$0xff]  ;;  %s2988_s7 = smov 88   ;;  %s2989_s8 = smov 80  }
  0x23   : > { %v3109_v1 = vld [vmem:[%s3103_s10 + $0x1] sm:$0xff]  ;;  %s2990_s9 = smov 72   ;;  %s5049_s0 = smov 112   ;;  %v283_v38 = vrot.slane %v3106_v0, 4 }
  0x24   : > { %v2486_v2 = vpack.i.bf16 %v3109_v1, %v3106_v0  ;;  %v3120_v3 = vld [vmem:[%s3103_s10 + $0x2] sm:$0xff]  ;;  %s5050_s23 = smov 108   ;;  %s5051_s22 = smov 104   ;;  %v614_v32 = vrot.slane %v3109_v1, 4 }
  0x25   : > { %s5052_s10 = smov 96  }
  0x26   : > { %2487 = vrot.lane.b32.xlu1 %v2486_v2, %s2978_s11  ;;  %2477 = vrot.lane.b32.xlu0 %v2486_v2, %s2979_s20 }
  0x27   : > { %2497 = vrot.lane.b32.xlu2 %v2486_v2, %s5006_s21  ;;  %s2991_s21 = smov 76  }
  0x2e   : > { %2492 = vrot.lane.b32.xlu1 %v2486_v2, %s5007_s24  ;;  %2482 = vrot.lane.b32.xlu0 %v2486_v2, %s2982_s27  ;;  %s2992_s24 = smov 68  }
  0x2f   : > { %2502 = vrot.lane.b32.xlu2 %v2486_v2, %s5008_s28  ;;  %s2993_s28 = smov 60  }
  0x36   : > { %2512 = vrot.lane.b32.xlu1 %v2486_v2, %s5009_s29  ;;  %2507 = vrot.lane.b32.xlu0 %v2486_v2, %s2985_s4  ;;  %s2994_s29 = smov 64  }
  0x37   : > { %2517 = vrot.lane.b32.xlu2 %v2486_v2, %s2986_s5 }
  0x3e   : > { %2527 = vrot.lane.b32.xlu1 %v2486_v2, %s2987_s6  ;;  %2522 = vrot.lane.b32.xlu0 %v2486_v2, %s2988_s7 }
  0x3f   : > { %2532 = vrot.lane.b32.xlu2 %v2486_v2, %s2989_s8 }
  0x46   : > { %2542 = vrot.lane.b32.xlu1 %v2486_v2, %s2990_s9  ;;  %2537 = vrot.lane.b32.xlu0 %v2486_v2, %s2991_s21 }
  0x47   : > { %2547 = vrot.lane.b32.xlu2 %v2486_v2, %s2992_s24 }
  0x4e   : > { %2557 = vrot.lane.b32.xlu1 %v2486_v2, %s2993_s28  ;;  %2552 = vrot.lane.b32.xlu0 %v2486_v2, %s2994_s29 }
  0x4f   : > { %892 = vrot.lane.b32.xlu2 %v3120_v3, %s2979_s20  ;;  %s3001_s20 = smov 20  }
  0x56   : > { %895 = vrot.lane.b32.xlu0 %v3120_v3, %s2982_s27  ;;  %898 = vrot.lane.b32.xlu1 %v3120_v3, %s2978_s11  ;;  %s3000_s11 = smov 16   ;;  %s3004_s27 = smov 32  }
  0x57   : > { %901 = vrot.lane.b32.xlu2 %v3120_v3, %s5049_s0  ;;  %s2997_s0 = smov 12  }
  0x5e   : > { %904 = vrot.lane.b32.xlu0 %v3120_v3, %s5050_s23  ;;  %907 = vrot.lane.b32.xlu1 %v3120_v3, %s5051_s22  ;;  %s2998_s22 = smov 4   ;;  %s2999_s23 = smov 8  }
  0x5f   : > { %910 = vrot.lane.b32.xlu2 %v3120_v3, %s2985_s4 }
  0x66   : > { %913 = vrot.lane.b32.xlu0 %v3120_v3, %s5052_s10  ;;  %916 = vrot.lane.b32.xlu1 %v3120_v3, %s2986_s5  ;;  %s2902_s10 = scalar_lea.hbm %s5005_s3, 512 }
  0x67   : > { %919 = vrot.lane.b32.xlu2 %v3120_v3, %s2988_s7 }
  0x6e   : > { %922 = vrot.lane.b32.xlu0 %v3120_v3, %s2987_s6  ;;  %925 = vrot.lane.b32.xlu1 %v3120_v3, %s2989_s8  ;;  %s208_s8 = sand.u32 1, %s2952_s13  }
  0x6f   : > { %928 = vrot.lane.b32.xlu2 %v3120_v3, %s2991_s21  ;;  %s3002_s21 = smov 28   ;;  %s2196_s4 = scalar_lea.sflag [#allocation3], %s208_s8 }
  0x76   : > { %931 = vrot.lane.b32.xlu0 %v3120_v3, %s2990_s9  ;;  %934 = vrot.lane.b32.xlu1 %v3120_v3, %s2992_s24  ;;  %s3003_s24 = smov 24  }
  0x77   : > { %937 = vrot.lane.b32.xlu2 %v3120_v3, %s2994_s29 }
  0x7e   : > { %940 = vrot.lane.b32.xlu0 %v3120_v3, %s2993_s28 }
  0x81   : > { %v3145_v4 = vpop.permute.xlu2 %2497 }
  0x82   : > { %v2500_v23 = vunpack.i.h.bf16 %v3145_v4  ;;  %v2499_v26 = vunpack.i.l.bf16 %v3145_v4 }
  0x84   : > { %v650_v34 = vrot.slane %v2500_v23, 4  ;;  %v3180_v43 = vrot.slane %v2499_v26, 4 }
  0x89   : > { %v3147_v5 = vpop.permute.xlu2 %2502 }
  0x8a   : > { %v2505_v16 = vunpack.i.h.bf16 %v3147_v5  ;;  %v2504_v35 = vunpack.i.l.bf16 %v3147_v5 }
  0x8c   : > { %v636_v44 = vrot.slane %v2505_v16, 4  ;;  %v305_v53 = vrot.slane %v2504_v35, 4 }
  0x91   : > { %v3150_v12 = vpop.permute.xlu2 %2517 }
  0x92   : > { %v2520_v41 = vunpack.i.h.bf16 %v3150_v12  ;;  %v2519_v42 = vunpack.i.l.bf16 %v3150_v12 }
  0x94   : > { %v738_v57 = vrot.slane %v2520_v41, 4  ;;  %v3204_v58 = vrot.slane %v2519_v42, 4 }
  0x98   : > { %v2488_v6 = vpop.permute.xlu1 %2487  ;;  %v2478_v7 = vpop.permute.xlu0 %2477 }
  0x99   : > { %v2480_v8 = vunpack.i.h.bf16 %v2478_v7  ;;  %v2490_v9 = vunpack.i.h.bf16 %v2488_v6  ;;  %v2489_v20 = vunpack.i.l.bf16 %v2488_v6  ;;  %v2479_v21 = vunpack.i.l.bf16 %v2478_v7  ;;  %v3159_v25 = vpop.permute.xlu2 %2532 }
  0x9a   : > { %v2535_v45 = vunpack.i.h.bf16 %v3159_v25  ;;  %v2534_v46 = vunpack.i.l.bf16 %v3159_v25 }
  0x9b   : > { %v626_v10 = vrot.slane %v2480_v8, 4  ;;  %v624_v24 = vrot.slane %v2490_v9, 4  ;;  %v293_v30 = vrot.slane %v2489_v20, 4  ;;  %v295_v31 = vrot.slane %v2479_v21, 4 }
  0x9c   : > { %v750_v61 = vrot.slane %v2535_v45, 4  ;;  %v3214_v62 = vrot.slane %v2534_v46, 4 }
  0x9d   : > { %v627_v11 = vsel %vm281_vm0, %v2490_v9, %v626_v10  ;;  %v625_v39 = vsel %vm281_vm0, %v624_v24, %v2480_v8  ;;  %v294_v47 = vsel %vm281_vm0, %v293_v30, %v2479_v21  ;;  %v296_v48 = vsel %vm281_vm0, %v2489_v20, %v295_v31 }
  0x9e   : > { %v3192_v51 = vperm.slane %v625_v39, %v3162_v27  ;;  %v3195_v52 = vperm.slane %v627_v11, %v3162_v27  ;;  %v3207_v59 = vperm.slane %v294_v47, %v3162_v27  ;;  %v304_v60 = vperm.slane %v296_v48, %v3162_v27 }
  0xa0   : > { %v2493_v13 = vpop.permute.xlu1 %2492  ;;  %v3152_v14 = vpop.permute.xlu0 %2482  ;;  %v660_v9 = vrot.slane %v3192_v51, 4  ;;  %v329_v19 = vrot.slane %v3207_v59, 4  ;;  %v341_v30 = vrot.slane %v304_v60, 4 }
  0xa1   : > { %v2495_v15 = vunpack.i.h.bf16 %v2493_v13  ;;  %v2484_v40 = vunpack.i.l.bf16 %v3152_v14  ;;  %v2494_v49 = vunpack.i.l.bf16 %v2493_v13  ;;  %v2485_v55 = vunpack.i.h.bf16 %v3152_v14  ;;  %v3227_v14 = vpop.permute.xlu2 %2547 }
  0xa2   : > { %v5013_v39 = vunpack.i.l.bf16 %v3227_v14 }
  0xa3   : > { %v638_v17 = vrot.slane %v2495_v15, 4  ;;  %v280_v56 = vrot.slane %v2484_v40, 4  ;;  %v637_v5 = vsel %vm281_vm0, %v636_v44, %v2495_v15  ;;  %v307_v6 = vrot.slane %v2494_v49, 4 }
  0xa4   : > { %v284_v7 = vsel %vm281_vm0, %v2484_v40, %v283_v38  ;;  %v306_v11 = vsel %vm281_vm0, %v305_v53, %v2494_v49  ;;  %v3237_v20 = vperm.slane %v637_v5, %v3162_v27  ;;  %v615_v21 = vsel %vm281_vm0, %v2485_v55, %v614_v32 }
  0xa5   : > { %v3156_v22 = vsel %vm281_vm0, %v2505_v16, %v638_v17  ;;  %v612_v16 = vrot.slane %v2485_v55, 4  ;;  %v282_v17 = vsel %vm281_vm0, %v280_v56, %v3106_v0  ;;  %v292_v24 = vperm.slane %v284_v7, %v3162_v27 }
  0xa6   : > { %v308_v31 = vsel %vm281_vm0, %v2504_v35, %v307_v6  ;;  %v2550_v0 = vunpack.i.h.bf16 %v3227_v14  ;;  %v288_v36 = vperm.slane %v282_v17, %v3162_v27  ;;  %v3251_v32 = vperm.slane %v3156_v22, %v3162_v27 }
  0xa7   : > { %v613_v40 = vsel %vm281_vm0, %v612_v16, %v3109_v1  ;;  %v3256_v35 = vperm.slane %v615_v21, %v3162_v27  ;;  %v316_v48 = vperm.slane %v308_v31, %v3162_v27  ;;  %v342_v49 = vsel %vm281_vm0, %v341_v30, %v292_v24 }
  0xa8   : > { %v3164_v28 = vpop.permute.xlu1 %2512  ;;  %v3166_v29 = vpop.permute.xlu0 %2507  ;;  %5053 = vst [vmem:[#allocation7_spill] sm:$0xff] %v3251_v32  ;;  %v343_v53 = vrot.slane %v292_v24, 4  ;;  %v3273_v5 = vperm.slane %v613_v40, %v3162_v27  ;;  %v331_v6 = vrot.slane %v288_v36, 4  ;;  %v429_v10 = vrot.slane %v5013_v39, 4 }
  0xa9   : > { %v2510_v33 = vunpack.i.h.bf16 %v3166_v29  ;;  %v2509_v13 = vunpack.i.l.bf16 %v3166_v29  ;;  %v2515_v15 = vunpack.i.h.bf16 %v3164_v28  ;;  %v330_v29 = vsel %vm281_vm0, %v329_v19, %v288_v36 }
  0xaa   : > { %v2514_v17 = vunpack.i.l.bf16 %v3164_v28 }
  0xab   : > { %v3189_v50 = vsel %vm281_vm0, %v2510_v33, %v650_v34  ;;  %v3243_v34 = vperm.slane %v306_v11, %v3162_v27  ;;  %v317_v37 = vrot.slane %v2509_v13, 4  ;;  %v726_v44 = vrot.slane %v2515_v15, 4 }
  0xac   : > { %v648_v1 = vrot.slane %v2510_v33, 4  ;;  %v320_v11 = vsel %vm281_vm0, %v2509_v13, %v3180_v43  ;;  %v3284_v33 = vperm.slane %v342_v49, %v3197_v54  ;;  %v3295_v43 = vperm.slane %v3189_v50, %v3162_v27 }
  0xad   : > { %v355_v22 = vrot.slane %v3243_v34, 4  ;;  %v318_v7 = vsel %vm281_vm0, %v317_v37, %v2499_v26  ;;  %v344_v26 = vsel %vm281_vm0, %v304_v60, %v343_v53  ;;  %v367_v13 = vrot.slane %v316_v48, 4 }
  0xae   : > { %5054 = vst [vmem:[#allocation8_spill] sm:$0xff] %v3295_v43  ;;  %v649_v19 = vsel %vm281_vm0, %v648_v1, %v2500_v23  ;;  %v324_v31 = vperm.slane %v318_v7, %v3162_v27  ;;  %v3305_v37 = vsel %vm281_vm0, %v3207_v59, %v331_v6  ;;  %v3308_v60 = vperm.slane %v330_v29, %v3197_v54 }
  0xaf   : > { %v3311_v40 = vperm.slane %v344_v26, %v3197_v54  ;;  %v395_v23 = vrot.slane %v2514_v17, 4  ;;  %v3316_v49 = vperm.slane %v649_v19, %v3162_v27  ;;  %v760_v59 = vrot.slane %v2550_v0, 4 }
  0xb0   : > { %v3216_v63 = vpop.permute.xlu1 %2527  ;;  %v3218_v2 = vpop.permute.xlu0 %2522 }
  0xb1   : > { %v2530_v8 = vunpack.i.h.bf16 %v3216_v63  ;;  %v2525_v38 = vunpack.i.h.bf16 %v3218_v2  ;;  %v2524_v19 = vunpack.i.l.bf16 %v3218_v2 }
  0xb3   : > { %v3233_v18 = vsel %vm281_vm0, %v2530_v8, %v738_v57  ;;  %v3269_v56 = vsel %vm281_vm0, %v2525_v38, %v726_v44  ;;  %v736_v50 = vrot.slane %v2530_v8, 4  ;;  %v2529_v44 = vunpack.i.l.bf16 %v3216_v63 }
  0xb4   : > { %v353_v8 = vrot.slane %v324_v31, 4  ;;  %v356_v63 = vsel %vm281_vm0, %v324_v31, %v355_v22  ;;  %v724_v53 = vrot.slane %v2525_v38, 4 }
  0xb5   : > { %v737_v26 = vsel %vm281_vm0, %v736_v50, %v2520_v41  ;;  %v405_v30 = vrot.slane %v2529_v44, 4  ;;  %v3347_v38 = vperm.slane %v356_v63, %v3197_v54 }
  0xb6   : > { %v354_v36 = vsel %vm281_vm0, %v353_v8, %v3243_v34 }
  0xb7   : > { %v406_v63 = vsel %vm281_vm0, %v405_v30, %v2519_v42 }
  0xb8   : > { %v3263_v55 = vpop.permute.xlu1 %2542  ;;  %v3280_v16 = vpop.permute.xlu0 %2537 }
  0xb9   : > { %v2545_v57 = vunpack.i.h.bf16 %v3263_v55  ;;  %v2540_v1 = vunpack.i.h.bf16 %v3280_v16  ;;  %v5012_v22 = vunpack.i.l.bf16 %v3263_v55 }
  0xbb   : > { %v3288_v21 = vsel %vm281_vm0, %v2545_v57, %v750_v61  ;;  %v328_v61 = vperm.slane %v320_v11, %v3162_v27  ;;  %v762_v24 = vrot.slane %v2540_v1, 4  ;;  %v417_v34 = vrot.slane %v5012_v22, 4 }
  0xbd   : > { %v365_v7 = vrot.slane %v328_v61, 4  ;;  %v368_v11 = vsel %vm281_vm0, %v328_v61, %v367_v13  ;;  %v661_v13 = vsel %vm281_vm0, %v660_v9, %v3273_v5  ;;  %v684_v61 = vrot.slane %v3316_v49, 4 }
  0xbe   : > { %v3342_v41 = vsel %vm281_vm0, %v2550_v0, %v762_v24  ;;  %v3351_v4 = vperm.slane %v368_v11, %v3197_v54  ;;  %v3354_v9 = vperm.slane %v737_v26, %v3162_v27  ;;  %v408_v0 = vsel %vm281_vm0, %v2529_v44, %v3204_v58 }
  0xbf   : > { %v366_v50 = vsel %vm281_vm0, %v365_v7, %v316_v48  ;;  %v393_v24 = vrot.slane %v2524_v19, 4  ;;  %v725_v48 = vsel %vm281_vm0, %v724_v53, %v2515_v15  ;;  %v748_v26 = vrot.slane %v2545_v57, 4 }
  0xc0   : > { %v3322_v6 = vpop.permute.xlu1 %2557  ;;  %v3344_v31 = vpop.permute.xlu0 %2552  ;;  %v761_v58 = vsel %vm281_vm0, %v760_v59, %v2540_v1  ;;  %v3374_v12 = vperm.slane %v366_v50, %v3197_v54  ;;  %v772_v28 = vrot.slane %v3354_v9, 4  ;;  %v3379_v15 = vperm.slane %v408_v0, %v3162_v27 }
  0xc1   : > { %v2560_v29 = vunpack.i.h.bf16 %v3322_v6  ;;  %v2555_v11 = vunpack.i.h.bf16 %v3344_v31  ;;  %v394_v30 = vsel %vm281_vm0, %v393_v24, %v2514_v17  ;;  %v3383_v53 = vperm.slane %v661_v13, %v3197_v54 }
  0xc2   : > { %v685_v59 = vsel %vm281_vm0, %v684_v61, %v3237_v20  ;;  %v3389_v1 = vperm.slane %v725_v48, %v3162_v27  ;;  %v767_v8 = vperm.slane %v761_v58, %v3162_v27  ;;  %v418_v17 = vsel %vm281_vm0, %v417_v34, %v2534_v46 }
  0xc3   : > { %v846_v2 = vrot.slane %v2560_v29, 4  ;;  %v851_v7 = vperm.slane %v2560_v29, %v3162_v27  ;;  %v836_v29 = vrot.slane %v2555_v11, 4  ;;  %v841_v50 = vperm.slane %v2555_v11, %v3162_v27 }
  0xc4   : > { %v396_v61 = vsel %vm281_vm0, %v2524_v19, %v395_v23  ;;  %v400_v0 = vperm.slane %v394_v30, %v3162_v27  ;;  %v2539_v48 = vunpack.i.l.bf16 %v3280_v16  ;;  %v424_v11 = vperm.slane %v418_v17, %v3162_v27 }
  0xc5   : > { %v847_v47 = vsel %vm281_vm0, 0.0, %v846_v2  ;;  %v856_v57 = vrot.slane %v851_v7, 4  ;;  %v749_v2 = vsel %vm281_vm0, %v748_v26, %v2535_v45  ;;  %v837_v24 = vsel %vm281_vm0, 0.0, %v836_v29 }
  0xc6   : > { %v855_v44 = vperm.slane %v847_v47, %v3162_v27  ;;  %v412_v47 = vperm.slane %v406_v63, %v3162_v27  ;;  %v773_v63 = vsel %vm281_vm0, %v772_v28, %v3389_v1  ;;  %v845_v45 = vperm.slane %v837_v24, %v3162_v27 }
  0xc7   : > { %v3407_v25 = vsel %vm281_vm0, %v856_v57, %v841_v50  ;;  %v858_v46 = vrot.slane %v841_v50, 4  ;;  %v755_v26 = vperm.slane %v749_v2, %v3162_v27  ;;  %v796_v23 = vrot.slane %v767_v8, 4 }
  0xc8   : > { %v868_v13 = vrot.slane %v855_v44, 4  ;;  %v2559_v19 = vunpack.i.l.bf16 %v3322_v6  ;;  %v870_v16 = vrot.slane %v845_v45, 4  ;;  %v779_v28 = vperm.slane %v773_v63, %v3197_v54 }
  0xc9   : > { %v3413_v34 = vsel %vm281_vm0, %v851_v7, %v858_v46  ;;  %v3420_v30 = vperm.slane %v354_v36, %v3197_v54  ;;  %v3424_v57 = vperm.slane %v3233_v18, %v3162_v27  ;;  %v453_v29 = vrot.slane %v3379_v15, 4 }
  0xca   : > { %v3416_v58 = vsel %vm281_vm0, %v868_v13, %v845_v45  ;;  %v2554_v6 = vunpack.i.l.bf16 %v3344_v31  ;;  %v441_v2 = vrot.slane %v412_v47, 4  ;;  %v430_v7 = vsel %vm281_vm0, %v429_v10, %v2539_v48 }
  0xcb   : > { %v3430_v17 = vsel %vm281_vm0, %v855_v44, %v870_v16  ;;  %v691_v13 = vperm.slane %v685_v59, %v3197_v54  ;;  %v3434_v50 = vperm.slane %v396_v61, %v3162_v27  ;;  %v443_v36 = vrot.slane %v400_v0, 4 }
  0xcc   : > { %5055 = vst [vmem:[#allocation9_spill] sm:$0xff] %v3430_v17  ;;  %v467_v24 = vrot.slane %v424_v11, 4  ;;  %v797_v18 = vsel %vm281_vm0, %v796_v23, %v755_v26  ;;  %v515_v63 = vrot.slane %v2559_v19, 4  ;;  %v710_v45 = vrot.slane %v3383_v53, 4 }
  0xcd   : > { %v803_v31 = vperm.slane %v797_v18, %v3197_v54  ;;  %v822_v46 = vrot.slane %v779_v28, 4  ;;  %v798_v42 = vrot.slane %v755_v26, 4  ;;  %v431_v10 = vrot.slane %v2539_v48, 4 }
  0xce   : > { %v436_v44 = vperm.slane %v430_v7, %v3162_v27  ;;  %v510_v16 = vperm.slane %v2554_v6, %v3162_v27  ;;  %v454_v59 = vsel %vm281_vm0, %v453_v29, %v3434_v50  ;;  %v3444_v61 = vsel %vm281_vm0, %v691_v13, %v710_v45 }
  0xcf   : > { %5056 = vst [vmem:[#allocation10_spill] sm:$0xff] %v3444_v61  ;;  %v3447_v23 = vsel %vm281_vm0, %v803_v31, %v822_v46  ;;  %v708_v22 = vrot.slane %v691_v13, 4  ;;  %v774_v39 = vrot.slane %v3389_v1, 4  ;;  %v442_v18 = vsel %vm281_vm0, %v441_v2, %v400_v0 }
  0xd0   : > { %v468_v48 = vsel %vm281_vm0, %v436_v44, %v467_v24  ;;  %v2566_v26 = vpack.i.bf16 %v3447_v23, %v3444_v61  ;;  %v444_v7 = vsel %vm281_vm0, %v412_v47, %v443_v36  ;;  %v516_v29 = vsel %vm281_vm0, 0.0, %v515_v63 }
  0xd1   : > { %v520_v45 = vperm.slane %v2559_v19, %v3162_v27  ;;  %v820_v17 = vrot.slane %v803_v31, 4  ;;  %v799_v46 = vsel %vm281_vm0, %v767_v8, %v798_v42  ;;  %v5057_v13 = vunpack.i.l.bf16 %v3227_v14 }
  0xd2   : > { %v465_v43 = vrot.slane %v436_v44, 4  ;;  %v527_v0 = vrot.slane %v510_v16, 4  ;;  %2567 = vrot.lane.b32.xlu0 %v2566_v26, %s2997_s0  ;;  %v3463_v2 = vperm.slane %v468_v48, %v3197_v54  ;;  %v3467_v47 = vsel %vm281_vm0, %v708_v22, %v3383_v53 }
  0xd3   : > { %v432_v1 = vsel %vm281_vm0, %v5057_v13, %v431_v10  ;;  %v3470_v19 = vsel %vm281_vm0, %v820_v17, %v779_v28  ;;  %v5058_v42 = vrot.slane %v3237_v20, 4  ;;  %v3477_v8 = vperm.slane %v516_v29, %v3162_v27 }
  0xd4   : > { %v505_v36 = vrot.slane %v2554_v6, 4  ;;  %v2561_v24 = vpack.i.bf16 %v3470_v19, %v3467_v47  ;;  %v5059_v63 = vrot.slane %v3273_v5, 4  ;;  %v525_v53 = vrot.slane %v520_v45, 4 }
  0xd5   : > { %v687_v14 = vsel %vm281_vm0, %v3316_v49, %v5058_v42  ;;  %v775_v20 = vsel %vm281_vm0, %v3354_v9, %v774_v39  ;;  %v807_v49 = vperm.slane %v799_v46, %v3197_v54  ;;  %v3490_v17 = vperm.slane %v432_v1, %v3162_v27 }
  0xd6   : > { %v663_v22 = vsel %vm281_vm0, %v3192_v51, %v5059_v63  ;;  %v695_v28 = vperm.slane %v687_v14, %v3197_v54  ;;  %v466_v6 = vsel %vm281_vm0, %v465_v43, %v424_v11  ;;  %v528_v31 = vsel %vm281_vm0, %v520_v45, %v527_v0  ;;  %2562 = vrot.lane.b32.xlu2 %v2561_v24, %s2997_s0 }
  0xd7   : > { %v381_v5 = vrot.slane %v3347_v38, 4  ;;  %v671_v51 = vperm.slane %v663_v22, %v3197_v54  ;;  %v783_v44 = vperm.slane %v775_v20, %v3197_v54  ;;  %v824_v48 = vrot.slane %v807_v49, 4 }
  0xd8   : > { %v712_v10 = vrot.slane %v695_v28, 4  ;;  %v493_v39 = vrot.slane %v3463_v2, 4  ;;  %v537_v9 = vrot.slane %v3477_v8, 4  ;;  %v506_v26 = vsel %vm281_vm0, 0.0, %v505_v36 }
  0xd9   : > { %v3503_v43 = vperm.slane %v3305_v37, %v3197_v54  ;;  %v526_v11 = vsel %vm281_vm0, %v525_v53, %v510_v16  ;;  %v3507_v29 = vperm.slane %v528_v31, %v3197_v54  ;;  %v3513_v46 = vsel %vm281_vm0, %v824_v48, %v783_v44  ;;  %v3556_v31 = vpop.permute.xlu2 %892 }
  0xda   : > { %v3510_v45 = vsel %vm281_vm0, %v712_v10, %v671_v51  ;;  %v455_v13 = vrot.slane %v3434_v50, 4  ;;  %v3523_v16 = vperm.slane %v444_v7, %v3197_v54  ;;  %v3526_v0 = vperm.slane %v454_v59, %v3197_v54 }
  0xdb   : > { %v2571_v1 = vpack.i.bf16 %v3513_v46, %v3510_v45  ;;  %v3520_v37 = vsel %vm281_vm0, %v381_v5, %v3503_v43  ;;  %v5061_v42 = vunpack.i.l.bf16 %v3263_v55  ;;  %v3533_v50 = vperm.slane %v466_v6, %v3197_v54  ;;  %v3558_v5 = vpop.permute.xlu0 %895 }
  0xdc   : > { %5060 = vst [vmem:[#allocation11_spill] sm:$0xff] %v3520_v37  ;;  %v3536_v36 = vperm.slane %v506_v26, %v3162_v27  ;;  %v3539_v24 = vperm.slane %v442_v18, %v3197_v54  ;;  %v477_v7 = vrot.slane %v3490_v17, 4  ;;  %v3543_v63 = vperm.slane %v526_v11, %v3197_v54 }
  0xdd   : > { %v420_v14 = vsel %vm281_vm0, %v5061_v42, %v3214_v62  ;;  %2572 = vrot.lane.b32.xlu1 %v2571_v1, %s2997_s0  ;;  %v3548_v55 = vsel %vm281_vm0, %v493_v39, %v3523_v16  ;;  %v1254_v59 = vrot.slane %v3520_v37, 1  ;;  %v1257_v18 = vrot.slane %v3507_v29, 1 }
  0xde   : > { %5062 = vst [vmem:[#allocation12_spill] sm:$0xff] %v3548_v55  ;;  %v538_v62 = vsel %vm281_vm0, %v537_v9, %v3536_v36  ;;  %v1255_v22 = vrot.slane %v3548_v55, 1  ;;  %v428_v53 = vperm.slane %v420_v14, %v3162_v27  ;;  %v714_v20 = vrot.slane %v671_v51, 4  ;;  %v3578_v14 = vpop.permute.xlu1 %898 }
  0xdf   : > { %v826_v6 = vrot.slane %v783_v44, 4  ;;  %v377_v39 = vrot.slane %v3420_v30, 4  ;;  %v489_v9 = vrot.slane %v3533_v50, 4  ;;  %v3565_v26 = vperm.slane %v538_v62, %v3197_v54 }
  0xe0   : > { %v1256_v10 = vsel %vm1243_vm1, %v1254_v59, %v1255_v22  ;;  %v1258_v48 = vsel %vm1243_vm1, %v1255_v22, %v1257_v18  ;;  %v3568_v1 = vsel %vm281_vm0, %v695_v28, %v714_v20  ;;  %v3575_v44 = vperm.slane %v3269_v56, %v3162_v27 }
  0xe1   : > { %v2591_v11 = vpack.i.bf16 %v1258_v48, %v1256_v10  ;;  %v3571_v51 = vsel %vm281_vm0, %v807_v49, %v826_v6  ;;  %v478_v42 = vsel %vm281_vm0, %v477_v7, %v428_v53  ;;  %v1247_v62 = vrot.slane %v3543_v63, 1 }
  0xe2   : > { %v2576_v59 = vpack.i.bf16 %v3571_v51, %v3568_v1  ;;  %v3585_v28 = vperm.slane %v3288_v21, %v3162_v27  ;;  %v479_v22 = vrot.slane %v428_v53, 4  ;;  %v3590_v56 = vsel %vm281_vm0, %v377_v39, %v3308_v60 }
  0xe3   : > { %2592 = vrot.lane.b32.xlu0 %v2591_v11, %s2998_s22  ;;  %5063 = vst [vmem:[#allocation13_spill] sm:$0xff] %v3590_v56  ;;  %v3594_v49 = vsel %vm281_vm0, %v489_v9, %v3539_v24  ;;  %v456_v7 = vsel %vm281_vm0, %v3379_v15, %v455_v13  ;;  %v499_v18 = vrot.slane %v3526_v0, 4  ;;  %v1244_v21 = vrot.slane %v3590_v56, 1 }
  0xe4   : > { %5064 = vst [vmem:[#allocation14_spill] sm:$0xff] %v3594_v49  ;;  %2577 = vrot.lane.b32.xlu2 %v2576_v59, %s2997_s0  ;;  %v1245_v53 = vrot.slane %v3594_v49, 1  ;;  %v3604_v20 = vperm.slane %v3342_v41, %v3162_v27  ;;  %v5065_v6 = vrot.slane %v3284_v33, 4  ;;  %v3613_v15 = vperm.slane %v478_v42, %v3197_v54 }
  0xe5   : > { %v553_v13 = vrot.slane %v3565_v26, 4  ;;  %v480_v11 = vsel %vm281_vm0, %v3490_v17, %v479_v22  ;;  %v3630_v32 = vperm.slane %v456_v7, %v3197_v54  ;;  %v945_v22 = vrot.slane %v3120_v3, 4  ;;  %v3643_v7 = vpop.permute.xlu2 %901 }
  0xe6   : > { %v3610_v10 = vsel %vm281_vm0, %v3374_v12, %v5065_v6  ;;  %v1246_v9 = vsel %vm1243_vm1, %v1244_v21, %v1245_v53  ;;  %v1248_v41 = vsel %vm1243_vm1, %v1245_v53, %v1247_v62  ;;  %v3624_v6 = vsel %vm281_vm0, %v3613_v15, %v499_v18 }
  0xe7   : > { %5066 = vst [vmem:[#allocation15_spill] sm:$0xff] %v3610_v10  ;;  %v2581_v59 = vpack.i.bf16 %v1248_v41, %v1246_v9  ;;  %v3627_v42 = vsel %vm281_vm0, 0.0, %v553_v13  ;;  %v1269_v39 = vrot.slane %v3610_v10, 1  ;;  %v1270_v21 = vrot.slane %v3624_v6, 1  ;;  %v3645_v9 = vpop.permute.xlu0 %904 }
  0xe8   : > { %5067 = vst [vmem:[#allocation16_spill] sm:$0xff] %v3624_v6  ;;  %v1272_v62 = vrot.slane %v3627_v42, 1  ;;  %v491_v18 = vrot.slane %v3539_v24, 4  ;;  %v3641_v13 = vperm.slane %v480_v11, %v3197_v54  ;;  %v379_v53 = vrot.slane %v3308_v60, 4  ;;  %v3667_v60 = vpop.permute.xlu1 %907 }
  0xe9   : > { %2582 = vrot.lane.b32.xlu1 %v2581_v59, %s2998_s22  ;;  %v1271_v41 = vsel %vm1243_vm1, %v1269_v39, %v1270_v21  ;;  %v3652_v17 = vperm.slane %v3407_v25, %v3197_v54  ;;  %v539_v59 = vrot.slane %v3536_v36, 4  ;;  %v3661_v10 = vperm.slane %v3413_v34, %v3197_v54 }
  0xea   : > { %v1273_v48 = vsel %vm1243_vm1, %v1270_v21, %v1272_v62  ;;  %v3657_v11 = vsel %vm281_vm0, %v3533_v50, %v491_v18  ;;  %v3665_v39 = vperm.slane %v3416_v58, %v3197_v54  ;;  %v3671_v25 = vsel %vm281_vm0, %v3420_v30, %v379_v53 }
  0xeb   : > { %5068 = vst [vmem:[#allocation17_spill] sm:$0xff] %v3652_v17  ;;  %v2606_v24 = vpack.i.bf16 %v1273_v48, %v1271_v41  ;;  %v549_v36 = vrot.slane %v3543_v63, 4  ;;  %v943_v50 = vrot.slane %v3558_v5, 4  ;;  %v946_v34 = vsel %vm281_vm0, %v3558_v5, %v945_v22 }
  0xec   : > { %5069 = vst [vmem:[#allocation18_spill] sm:$0xff] %v3657_v11  ;;  %v1250_v58 = vrot.slane %v3657_v11, 1  ;;  %v957_v62 = vrot.slane %v3556_v31, 4  ;;  %v383_v53 = vrot.slane %v3503_v43, 4  ;;  %v3688_v18 = vsel %vm281_vm0, %v3477_v8, %v539_v59 }
  0xed   : > { %5070 = vst [vmem:[#allocation19_spill] sm:$0xff] %v3665_v39  ;;  %2607 = vrot.lane.b32.xlu0 %v2606_v24, %s2998_s22  ;;  %v3683_v30 = vsel %vm281_vm0, 0.0, %v549_v36  ;;  %v1249_v5 = vrot.slane %v3671_v25, 1  ;;  %v3694_v24 = vperm.slane %v946_v34, %v3162_v27  ;;  %v495_v36 = vrot.slane %v3523_v16, 4 }
  0xee   : > { %5071 = vst [vmem:[#allocation20_spill] sm:$0xff] %v3671_v25  ;;  %v1252_v22 = vrot.slane %v3683_v30, 1  ;;  %v3698_v21 = vsel %vm281_vm0, %v3347_v38, %v383_v53  ;;  %v551_v43 = vrot.slane %v3507_v29, 4  ;;  %v944_v8 = vsel %vm281_vm0, %v943_v50, %v3120_v3 }
  0xef   : > { %5072 = vst [vmem:[#allocation21_spill] sm:$0xff] %v3698_v21  ;;  %v955_v59 = vrot.slane %v3578_v14, 4  ;;  %v1251_v48 = vsel %vm1243_vm1, %v1249_v5, %v1250_v58  ;;  %v958_v34 = vsel %vm281_vm0, %v3578_v14, %v957_v62  ;;  %v3711_v38 = vsel %vm281_vm0, %v3463_v2, %v495_v36  ;;  %v3726_v2 = vpop.permute.xlu0 %913 }
  0xf0   : > { %v1253_v41 = vsel %vm1243_vm1, %v1250_v58, %v1252_v22  ;;  %5073 = vst [vmem:[#allocation22_spill] sm:$0xff] %v3711_v38  ;;  %v3714_v16 = vsel %vm281_vm0, 0.0, %v551_v43  ;;  %v1259_v53 = vrot.slane %v3698_v21, 1  ;;  %v1260_v3 = vrot.slane %v3711_v38, 1  ;;  %v3736_v61 = vpop.permute.xlu1 %916 }
  0xf1   : > { %v2586_v39 = vpack.i.bf16 %v1253_v41, %v1251_v48  ;;  %v1262_v50 = vrot.slane %v3714_v16, 1  ;;  %v1334_v5 = vrot.slane %v3594_v49, 2  ;;  %v3721_v58 = vperm.slane %v944_v8, %v3162_v27  ;;  %v3724_v48 = vpop.permute.xlu2 %910 }
  0xf2   : > { %v1005_v14 = vrot.slane %v3694_v24, 4  ;;  %v1333_v62 = vrot.slane %v3590_v56, 2  ;;  %v1336_v41 = vrot.slane %v3543_v63, 2  ;;  %v966_v22 = vperm.slane %v958_v34, %v3162_v27 }
  0xf3   : > { %5074 = vst [vmem:[#allocation23_spill] sm:$0xff] %v3721_v58  ;;  %2587 = vrot.lane.b32.xlu2 %v2586_v39, %s2998_s22  ;;  %v1261_v36 = vsel %vm1243_vm1, %v1259_v53, %v1260_v3  ;;  %v1263_v43 = vsel %vm1243_vm1, %v1260_v3, %v1262_v50  ;;  %v956_v8 = vsel %vm281_vm0, %v955_v59, %v3556_v31  ;;  %v993_v3 = vrot.slane %v3721_v58, 4 }
  0xf4   : > { %v2596_v49 = vpack.i.bf16 %v1263_v43, %v1261_v36  ;;  %v1335_v17 = vsel %vm1332_vm2, %v1333_v62, %v1334_v5  ;;  %v1337_v39 = vsel %vm1332_vm2, %v1334_v5, %v1336_v41  ;;  %v385_v31 = vrot.slane %v3374_v12, 4 }
  0xf5   : > { %v2621_v53 = vpack.i.bf16 %v1337_v39, %v1335_v17  ;;  %v497_v59 = vrot.slane %v3613_v15, 4  ;;  %v3750_v5 = vperm.slane %v956_v8, %v3162_v27  ;;  %v1003_v41 = vrot.slane %v966_v22, 4 }
  0xf6   : > { %2597 = vrot.lane.b32.xlu1 %v2596_v49, %s2998_s22  ;;  %v501_v17 = vrot.slane %v3641_v13, 4  ;;  %v3756_v43 = vsel %vm281_vm0, %v966_v22, %v1005_v14  ;;  %v3760_v12 = vsel %vm281_vm0, %v385_v31, %v3284_v33  ;;  %v1267_v49 = vrot.slane %v3565_v26, 1 }
  0xf7   : > { %5075 = vst [vmem:[#allocation24_spill] sm:$0xff] %v3750_v5  ;;  %2622 = vrot.lane.b32.xlu0 %v2621_v53, %s2999_s23  ;;  %v3768_v53 = vsel %vm281_vm0, %v497_v59, %v3526_v0  ;;  %v1264_v56 = vrot.slane %v3760_v12, 1  ;;  %v5078_v33 = vrot.slane %v3351_v4, 4  ;;  %v994_v0 = vsel %vm281_vm0, %v3750_v5, %v993_v3 }
  0xf8   : > { %5076 = vst [vmem:[#allocation25_spill] sm:$0xff] %v3760_v12  ;;  %v1265_v14 = vrot.slane %v3768_v53, 1  ;;  %v3780_v31 = vsel %vm281_vm0, %v501_v17, %v3630_v32  ;;  %v981_v59 = vrot.slane %v3645_v9, 4  ;;  %v3788_v62 = vperm.slane %v3688_v18, %v3197_v54  ;;  %v3806_v58 = vpop.permute.xlu1 %925 }
  0xf9   : > { %5077 = vst [vmem:[#allocation26_spill] sm:$0xff] %v3768_v53  ;;  %v3776_v22 = vsel %vm281_vm0, %v5078_v33, %v3311_v40  ;;  %v969_v39 = vrot.slane %v3643_v7, 4  ;;  %v3791_v15 = vpop.permute.xlu2 %919  ;;  %v3793_v33 = vpop.permute.xlu0 %922  ;;  %v1275_v34 = vrot.slane %v3780_v31, 1  ;;  %v1349_v18 = vrot.slane %v3711_v38, 2 }
  0xfa   : > { %5079 = vst [vmem:[#allocation27_spill] sm:$0xff] %v3776_v22  ;;  %v1266_v17 = vsel %vm1243_vm1, %v1264_v56, %v1265_v14  ;;  %v1268_v63 = vsel %vm1243_vm1, %v1265_v14, %v1267_v49  ;;  %v1274_v3 = vrot.slane %v3776_v22, 1  ;;  %v1277_v8 = vrot.slane %v3788_v62, 1 }
  0xfb   : > { %5080 = vst [vmem:[#allocation28_spill] sm:$0xff] %v3780_v31  ;;  %v2601_v50 = vpack.i.bf16 %v1268_v63, %v1266_v17  ;;  %v3802_v36 = vperm.slane %v994_v0, %v3197_v54  ;;  %v1004_v5 = vsel %vm281_vm0, %v1003_v41, %v3694_v24  ;;  %v1348_v56 = vrot.slane %v3698_v21, 2 }
  0xfc   : > { %v1351_v49 = vrot.slane %v3714_v16, 2  ;;  %v967_v63 = vrot.slane %v3667_v60, 4  ;;  %v982_v14 = vsel %vm281_vm0, %v3724_v48, %v981_v59  ;;  %v1276_v17 = vsel %vm1243_vm1, %v1274_v3, %v1275_v34 }
  0xfd   : > { %5081 = vst [vmem:[#allocation29_spill] sm:$0xff] %v3802_v36  ;;  %2602 = vrot.lane.b32.xlu2 %v2601_v50, %s2998_s22  ;;  %v1278_v0 = vsel %vm1243_vm1, %v1275_v34, %v1277_v8  ;;  %v1350_v24 = vsel %vm1332_vm2, %v1348_v56, %v1349_v18  ;;  %v391_v21 = vrot.slane %v3311_v40, 4  ;;  %v3820_v16 = vperm.slane %v1004_v5, %v3197_v54 }
  0xfe   : > { %v2611_v38 = vpack.i.bf16 %v1278_v0, %v1276_v17  ;;  %v1352_v41 = vsel %vm1332_vm2, %v1349_v18, %v1351_v49  ;;  %v970_v36 = vsel %vm281_vm0, %v3667_v60, %v969_v39  ;;  %v503_v50 = vrot.slane %v3630_v32, 4 }
  0xff   : > { %v2636_v59 = vpack.i.bf16 %v1352_v41, %v1350_v24  ;;  %v979_v3 = vrot.slane %v3724_v48, 4  ;;  %v990_v34 = vperm.slane %v982_v14, %v3162_v27  ;;  %v3830_v8 = vsel %vm281_vm0, %v3351_v4, %v391_v21 }
 0x100   : > { %2612 = vrot.lane.b32.xlu1 %v2611_v38, %s2998_s22  ;;  %5082 = vst [vmem:[#allocation30_spill] sm:$0xff] %v3830_v8  ;;  %v555_v40 = vrot.slane %v3788_v62, 4  ;;  %v968_v5 = vsel %vm281_vm0, %v967_v63, %v3643_v7  ;;  %v3838_v32 = vsel %vm281_vm0, %v3641_v13, %v503_v50  ;;  %v1339_v60 = vrot.slane %v3657_v11, 2 }
 0x101   : > { %2637 = vrot.lane.b32.xlu0 %v2636_v59, %s2999_s23  ;;  %5083 = vst [vmem:[#allocation31_spill] sm:$0xff] %v3838_v32  ;;  %v1341_v48 = vrot.slane %v3683_v30, 2  ;;  %v978_v38 = vperm.slane %v970_v36, %v3162_v27  ;;  %v1069_v4 = vrot.slane %v3736_v61, 4  ;;  %v1280_v39 = vrot.slane %v3838_v32, 1  ;;  %v3858_v14 = vpop.permute.xlu2 %928  ;;  %v932_v17 = vpop.permute.xlu0 %931 }
 0x102   : > { %v3845_v21 = vsel %vm281_vm0, 0.0, %v555_v40  ;;  %v1279_v7 = vrot.slane %v3830_v8, 1  ;;  %v1338_v13 = vrot.slane %v3671_v25, 2  ;;  %v3853_v49 = vperm.slane %v968_v5, %v3162_v27  ;;  %v3864_v5 = vpop.permute.xlu1 %934 }
 0x103   : > { %v1282_v18 = vrot.slane %v3845_v21, 1  ;;  %v1342_v56 = vsel %vm1332_vm2, %v1339_v60, %v1341_v48  ;;  %v980_v30 = vsel %vm281_vm0, %v979_v3, %v3645_v9  ;;  %v1027_v36 = vrot.slane %v990_v34, 4 }
 0x104   : > { %5084 = vst [vmem:[#allocation32_spill] sm:$0xff] %v3853_v49  ;;  %v1081_v63 = vrot.slane %v3806_v58, 4  ;;  %v1093_v0 = vrot.slane %v3858_v14, 4  ;;  %v1281_v24 = vsel %vm1243_vm1, %v1279_v7, %v1280_v39  ;;  %v1340_v59 = vsel %vm1332_vm2, %v1338_v13, %v1339_v60 }
 0x105   : > { %v1283_v41 = vsel %vm1243_vm1, %v1280_v39, %v1282_v18  ;;  %v2626_v40 = vpack.i.bf16 %v1342_v56, %v1340_v59  ;;  %v1364_v9 = vrot.slane %v3780_v31, 2  ;;  %v1366_v3 = vrot.slane %v3788_v62, 2  ;;  %v5091_v31 = vld [vmem:[#allocation15_spill] sm:$0xff] }
 0x106   : > { %v2616_v50 = vpack.i.bf16 %v1283_v41, %v1281_v24  ;;  %v1029_v48 = vrot.slane %v978_v38, 4  ;;  %v1057_v25 = vrot.slane %v3726_v2, 4  ;;  %v1070_v11 = vsel %vm281_vm0, %v3793_v33, %v1069_v4 }
 0x107   : > { %v1363_v7 = vrot.slane %v3776_v22, 2  ;;  %v1017_v60 = vrot.slane %v3853_v49, 4  ;;  %v1079_v18 = vrot.slane %v932_v17, 4  ;;  %v1082_v13 = vsel %vm281_vm0, %v932_v17, %v1081_v63 }
 0x108   : > { %2617 = vrot.lane.b32.xlu2 %v2616_v50, %s2998_s22  ;;  %2627 = vrot.lane.b32.xlu1 %v2626_v40, %s2999_s23  ;;  %v3878_v62 = vperm.slane %v980_v30, %v3162_v27  ;;  %v1094_v56 = vsel %vm281_vm0, %v3864_v5, %v1093_v0  ;;  %v1367_v24 = vsel %vm1332_vm2, %v1364_v9, %v1366_v3  ;;  %v1055_v59 = vrot.slane %v3791_v15, 4 }
 0x109   : > { %v1365_v4 = vsel %vm1332_vm2, %v1363_v7, %v1364_v9  ;;  %v1028_v41 = vsel %vm281_vm0, %v1027_v36, %v978_v38  ;;  %v3887_v63 = vperm.slane %v1070_v11, %v3162_v27  ;;  %v3891_v30 = vsel %vm281_vm0, %v990_v34, %v1029_v48  ;;  %v3923_v7 = vpop.permute.xlu0 %940 }
 0x10a   : > { %v2651_v17 = vpack.i.bf16 %v1367_v24, %v1365_v4  ;;  %v1058_v0 = vsel %vm281_vm0, %v3791_v15, %v1057_v25  ;;  %v3896_v40 = vperm.slane %v1082_v13, %v3162_v27  ;;  %v1080_v38 = vsel %vm281_vm0, %v1079_v18, %v3806_v58  ;;  %v5086_v15 = vld [vmem:[#allocation7_spill] sm:$0xff] }
 0x10b   : > { %v3901_v36 = vperm.slane %v1094_v56, %v3162_v27  ;;  %v1344_v11 = vrot.slane %v3548_v55, 2  ;;  %v1346_v9 = vrot.slane %v3507_v29, 2  ;;  %v3908_v34 = vsel %vm281_vm0, %v3878_v62, %v1017_v60 }
 0x10c   : > { %2652 = vrot.lane.b32.xlu0 %v2651_v17, %s2999_s23  ;;  %v3911_v25 = vperm.slane %v1028_v41, %v3197_v54  ;;  %v1343_v58 = vrot.slane %v3520_v37, 2  ;;  %v3917_v3 = vsel %vm281_vm0, %v1055_v59, %v3726_v2  ;;  %v3920_v48 = vperm.slane %v1058_v0, %v3162_v27 }
 0x10d   : > { %v1354_v60 = vrot.slane %v3768_v53, 2  ;;  %v3927_v18 = vperm.slane %v1080_v38, %v3162_v27  ;;  %v1347_v4 = vsel %vm1332_vm2, %v1344_v11, %v1346_v9  ;;  %v1091_v2 = vrot.slane %v3864_v5, 4 }
 0x10e   : > { %v1345_v56 = vsel %vm1332_vm2, %v1343_v58, %v1344_v11  ;;  %v1139_v24 = vrot.slane %v3901_v36, 4  ;;  %v1353_v59 = vrot.slane %v3760_v12, 2  ;;  %v1177_v17 = vrot.slane %v3923_v7, 4  ;;  %v5087_v58 = vld [vmem:[#allocation8_spill] sm:$0xff] }
 0x10f   : > { %v2631_v41 = vpack.i.bf16 %v1347_v4, %v1345_v56  ;;  %v1356_v0 = vrot.slane %v3565_v26, 2  ;;  %v5085_v38 = vrot.slane %v3195_v52, 4  ;;  %v5088_v29 = vrot.slane %v5087_v58, 4 }
 0x110   : > { %v1355_v5 = vsel %vm1332_vm2, %v1353_v59, %v1354_v60  ;;  %v5089_v56 = vrot.slane %v3424_v57, 4  ;;  %v5090_v4 = vrot.slane %v3604_v20, 4  ;;  %v1359_v22 = vrot.slane %v3624_v6, 2 }
 0x111   : > { %v673_v13 = vsel %vm281_vm0, %v5085_v38, %v3256_v35  ;;  %v697_v11 = vsel %vm281_vm0, %v5088_v29, %v5086_v15  ;;  %2632 = vrot.lane.b32.xlu2 %v2631_v41, %s2999_s23  ;;  %v1357_v50 = vsel %vm1332_vm2, %v1354_v60, %v1356_v0  ;;  %v1361_v12 = vrot.slane %v3627_v42, 2 }
 0x112   : > { %v703_v9 = vperm.slane %v697_v11, %v3197_v54  ;;  %v785_v26 = vsel %vm281_vm0, %v5089_v56, %v3575_v44  ;;  %v809_v38 = vsel %vm281_vm0, %v5090_v4, %v3585_v28  ;;  %v679_v29 = vperm.slane %v673_v13, %v3197_v54 }
 0x113   : > { %v791_v41 = vperm.slane %v785_v26, %v3197_v54  ;;  %v815_v59 = vperm.slane %v809_v38, %v3197_v54  ;;  %v2641_v39 = vpack.i.bf16 %v1357_v50, %v1355_v5  ;;  %v1358_v53 = vrot.slane %v5091_v31, 2 }
 0x114   : > { %v716_v11 = vrot.slane %v703_v9, 4  ;;  %v1369_v37 = vrot.slane %v3838_v32, 2  ;;  %v1371_v4 = vrot.slane %v3845_v21, 2  ;;  %v1362_v13 = vsel %vm1332_vm2, %v1359_v22, %v1361_v12 }
 0x115   : > { %v828_v56 = vrot.slane %v815_v59, 4  ;;  %2642 = vrot.lane.b32.xlu1 %v2641_v39, %s2999_s23  ;;  %v1368_v50 = vrot.slane %v3830_v8, 2  ;;  %v5092_v0 = vrot.slane %v3256_v35, 4  ;;  %v3977_v5 = vsel %vm281_vm0, %v1091_v2, %v3858_v14 }
 0x116   : > { %v3967_v60 = vsel %vm281_vm0, %v716_v11, %v679_v29  ;;  %v3981_v21 = vsel %vm281_vm0, %v1139_v24, %v3896_v40  ;;  %v1360_v12 = vsel %vm1332_vm2, %v1358_v53, %v1359_v22  ;;  %v1178_v26 = vsel %vm281_vm0, 0.0, %v1177_v17  ;;  %v4001_v22 = vpop.permute.xlu2 %937 }
 0x117   : > { %v675_v42 = vsel %vm281_vm0, %v3195_v52, %v5092_v0  ;;  %v3984_v39 = vsel %vm281_vm0, %v828_v56, %v791_v41  ;;  %v2646_v38 = vpack.i.bf16 %v1362_v13, %v1360_v12  ;;  %v1370_v52 = vsel %vm1332_vm2, %v1368_v50, %v1369_v37 }
 0x118   : > { %v2656_v35 = vpack.i.bf16 %v3984_v39, %v3967_v60  ;;  %v1372_v14 = vsel %vm1332_vm2, %v1369_v37, %v1371_v4  ;;  %v683_v2 = vperm.slane %v675_v42, %v3197_v54  ;;  %v5093_v24 = vrot.slane %v5086_v15, 4 }
 0x119   : > { %v5094_v56 = vrot.slane %v3575_v44, 4  ;;  %2647 = vrot.lane.b32.xlu2 %v2646_v38, %s2999_s23  ;;  %v2661_v17 = vpack.i.bf16 %v1372_v14, %v1370_v52  ;;  %v718_v15 = vrot.slane %v679_v29, 4  ;;  %v830_v50 = vrot.slane %v791_v41, 4 }
 0x11a   : > { %v699_v11 = vsel %vm281_vm0, %v5087_v58, %v5093_v24  ;;  %2657 = vrot.lane.b32.xlu0 %v2656_v35, %s2997_s0  ;;  %v722_v13 = vrot.slane %v683_v2, 4  ;;  %v5095_v58 = vrot.slane %v3585_v28, 4  ;;  %v5097_v0 = vrot.slane %v3510_v45, 1 }
 0x11b   : > { %v787_v53 = vsel %vm281_vm0, %v3424_v57, %v5094_v56  ;;  %v707_v37 = vperm.slane %v699_v11, %v3197_v54  ;;  %v5096_v57 = vrot.slane %v3513_v46, 1  ;;  %v4020_v29 = vsel %vm281_vm0, %v703_v9, %v718_v15 }
 0x11c   : > { %v795_v4 = vperm.slane %v787_v53, %v3197_v54  ;;  %v811_v44 = vsel %vm281_vm0, %v3604_v20, %v5095_v58  ;;  %v1167_v28 = vrot.slane %v4001_v22, 4  ;;  %v4024_v52 = vperm.slane %v1178_v26, %v3162_v27 }
 0x11d   : > { %v4016_v42 = vsel %vm1243_vm1, %v5097_v0, %v5096_v57  ;;  %v819_v12 = vperm.slane %v811_v44, %v3197_v54  ;;  %v720_v38 = vrot.slane %v707_v37, 4  ;;  %v4027_v20 = vsel %vm281_vm0, %v707_v37, %v722_v13  ;;  %2662 = vrot.lane.b32.xlu1 %v2661_v17, %s2999_s23  ;;  %v5098_v44 = vld [vmem:[#allocation17_spill] sm:$0xff] }
 0x11e   : > { %v834_v35 = vrot.slane %v795_v4, 4  ;;  %v4030_v41 = vsel %vm281_vm0, %v815_v59, %v830_v50  ;;  %v1513_v14 = vrot.slane %v3967_v60, 1  ;;  %v1601_v24 = vrot.slane %v3967_v60, 2 }
 0x11f   : > { %v721_v11 = vsel %vm281_vm0, %v720_v38, %v683_v2  ;;  %v1514_v26 = vrot.slane %v3984_v39, 1  ;;  %v1602_v56 = vrot.slane %v3984_v39, 2  ;;  %v832_v59 = vrot.slane %v819_v12, 4 }
 0x120   : > { %v4036_v9 = vsel %vm281_vm0, %v819_v12, %v834_v35  ;;  %v1523_v37 = vrot.slane %v721_v11, 1  ;;  %v1611_v15 = vrot.slane %v721_v11, 2  ;;  %v1518_v60 = vrot.slane %v4020_v29, 1  ;;  %v5100_v35 = vld [vmem:[#allocation10_spill] sm:$0xff] }
 0x121   : > { %v2676_v53 = vpack.i.bf16 %v4036_v9, %v4027_v20  ;;  %v833_v17 = vsel %vm281_vm0, %v832_v59, %v795_v4  ;;  %v2666_v58 = vpack.i.bf16 %v4030_v41, %v4020_v29  ;;  %v1506_v2 = vrot.slane %v3661_v10, 1 }
 0x122   : > { %v880_v50 = vrot.slane %v5098_v44, 4  ;;  %v1524_v39 = vrot.slane %v833_v17, 1  ;;  %v1612_v57 = vrot.slane %v833_v17, 2  ;;  %v2671_v0 = vpack.i.bf16 %v833_v17, %v721_v11 }
 0x123   : > { %2677 = vrot.lane.b32.xlu0 %v2676_v53, %s2997_s0  ;;  %v5099_v12 = vrot.slane %v3447_v23, 1  ;;  %v5101_v38 = vrot.slane %v5100_v35, 1  ;;  %v5102_v4 = vrot.slane %v3513_v46, 1  ;;  %v5103_v32 = vrot.slane %v3470_v19, 1 }
 0x124   : > { %v4060_v8 = vsel %vm281_vm0, 0.0, %v880_v50  ;;  %v5104_v53 = vrot.slane %v3467_v47, 1  ;;  %v1496_v11 = vrot.slane %v5098_v44, 1  ;;  %2672 = vrot.lane.b32.xlu2 %v2671_v0, %s2997_s0  ;;  %v1525_v50 = vsel %vm1243_vm1, %v1523_v37, %v1524_v39  ;;  %v5107_v0 = vld [vmem:[#allocation19_spill] sm:$0xff] }
 0x125   : > { %v1500_v13 = vsel %vm1243_vm1, %v5101_v38, %v5099_v12  ;;  %v1507_v59 = vsel %vm1243_vm1, %v5102_v4, %v1506_v2  ;;  %v1501_v12 = vrot.slane %v4060_v8, 1  ;;  %v5105_v38 = vrot.slane %v4030_v41, 1  ;;  %2667 = vrot.lane.b32.xlu1 %v2666_v58, %s2997_s0  ;;  %s2336_s0 = sshll.u32 %s208_s8, 7 }
 0x126   : > { %v1495_v31 = vsel %vm1243_vm1, %v5104_v53, %v5103_v32  ;;  %v2691_v17 = vpack.i.bf16 %v1507_v59, %v4016_v42  ;;  %v5106_v4 = vmov %v5103_v32  ;;  %v4082_v53 = vsel %vm1243_vm1, %v1513_v14, %v1514_v26  ;;  %s4922_s22 = scalar_lea.vmem [#allocation2], %s2336_s0 }
 0x127   : > { %v4074_v2 = vsel %vm1243_vm1, %v1518_v60, %v5105_v38  ;;  %v1497_v6 = vsel %vm1243_vm1, %v5106_v4, %v1496_v11  ;;  %v1516_v42 = vrot.slane %v5107_v0, 1  ;;  %v5108_v59 = vrot.slane %v3447_v23, 1  ;;  %v5111_v4 = vld [vmem:[#allocation9_spill] sm:$0xff] }
 0x128   : > { %v2706_v32 = vpack.i.bf16 %v1525_v50, %v4074_v2  ;;  %v2681_v38 = vpack.i.bf16 %v1497_v6, %v1495_v31  ;;  %v882_v37 = vrot.slane %v3661_v10, 4  ;;  %v5109_v55 = vrot.slane %v3571_v51, 1 }
 0x129   : > { %v1502_v60 = vsel %vm1243_vm1, %v5108_v59, %v1501_v12  ;;  %v5110_v11 = vrot.slane %v3568_v1, 1  ;;  %v1517_v50 = vsel %vm1243_vm1, %v1514_v26, %v1516_v42  ;;  %v4100_v58 = vperm.slane %v5111_v4, %v3197_v54 }
 0x12a   : > { %v2686_v14 = vpack.i.bf16 %v1502_v60, %v1500_v13  ;;  %v4103_v49 = vsel %vm1332_vm2, %v1611_v15, %v1612_v57  ;;  %v2701_v6 = vpack.i.bf16 %v1517_v50, %v4082_v53  ;;  %v4107_v31 = vsel %vm281_vm0, 0.0, %v882_v37 }
 0x12b   : > { %v4095_v2 = vsel %vm1243_vm1, %v5110_v11, %v5109_v55  ;;  %v4110_v12 = vsel %vm1332_vm2, %v1601_v24, %v1602_v56  ;;  %v1604_v55 = vrot.slane %v5107_v0, 2  ;;  %v1511_v13 = vrot.slane %v4107_v31, 1  ;;  %2692 = vrot.lane.b32.xlu0 %v2691_v17, %s3000_s11 }
 0x12c   : > { %v1614_v26 = vrot.slane %v4100_v58, 2  ;;  %v884_v42 = vrot.slane %v5107_v0, 4  ;;  %v1526_v59 = vrot.slane %v4100_v58, 1  ;;  %v4119_v15 = vperm.slane %v3981_v21, %v3197_v54  ;;  %2687 = vrot.lane.b32.xlu2 %v2686_v14, %s3000_s11 }
 0x12d   : > { %v1168_v53 = vsel %vm281_vm0, 0.0, %v1167_v28  ;;  %v1199_v60 = vrot.slane %v4024_v52, 4  ;;  %v4125_v24 = vsel %vm1332_vm2, %v1602_v56, %v1604_v55  ;;  %v5112_v37 = vrot.slane %v3571_v51, 1  ;;  %2682 = vrot.lane.b32.xlu1 %v2681_v38, %s3000_s11 }
 0x12e   : > { %v4131_v11 = vsel %vm1332_vm2, %v1612_v57, %v1614_v26  ;;  %v2716_v21 = vpack.i.bf16 %v4125_v24, %v4110_v12  ;;  %v4136_v28 = vsel %vm281_vm0, 0.0, %v884_v42  ;;  %v4144_v4 = vsel %vm1243_vm1, %v1524_v39, %v1526_v59 }
 0x12f   : > { %v1512_v0 = vsel %vm1243_vm1, %v5112_v37, %v1511_v13  ;;  %v2721_v56 = vpack.i.bf16 %v4131_v11, %v4103_v49  ;;  %v1521_v50 = vrot.slane %v4136_v28, 1  ;;  %v4148_v57 = vperm.slane %v3908_v34, %v3197_v54 }
 0x130   : > { %v2696_v17 = vpack.i.bf16 %v1512_v0, %v4095_v2  ;;  %v4152_v55 = vperm.slane %v3891_v30, %v3197_v54  ;;  %v4156_v14 = vperm.slane %v3917_v3, %v3162_v27  ;;  %v5113_v49 = vrot.slane %v3887_v63, 4 }
 0x131   : > { %v1117_v39 = vrot.slane %v3920_v48, 4  ;;  %v5114_v13 = vrot.slane %v3793_v33, 4  ;;  %v1176_v26 = vperm.slane %v1168_v53, %v3162_v27  ;;  %v5115_v30 = vrot.slane %v4030_v41, 1 }
 0x132   : > { %v1116_v2 = vsel %vm281_vm0, %v5113_v49, %v3920_v48  ;;  %v1129_v42 = vrot.slane %v3927_v18, 4  ;;  %v4177_v59 = vperm.slane %v3977_v5, %v3162_v27  ;;  %v5116_v48 = vrot.slane %v3896_v40, 4 }
 0x133   : > { %v1068_v34 = vsel %vm281_vm0, %v5114_v13, %v3736_v61  ;;  %v4172_v3 = vsel %vm1243_vm1, %v5115_v30, %v1521_v50  ;;  %v1047_v38 = vrot.slane %v3911_v25, 4  ;;  %v4187_v53 = vperm.slane %v1116_v2, %v3197_v54  ;;  %2707 = vrot.lane.b32.xlu0 %v2706_v32, %s3000_s11 }
 0x134   : > { %v1142_v61 = vsel %vm281_vm0, %v3901_v36, %v5116_v48  ;;  %v1159_v37 = vrot.slane %v4119_v15, 4  ;;  %v1200_v0 = vsel %vm281_vm0, %v1199_v60, %v1176_v26  ;;  %v4193_v5 = vperm.slane %v3756_v43, %v3197_v54  ;;  %2702 = vrot.lane.b32.xlu2 %v2701_v6, %s3000_s11 }
 0x135   : > { %v1105_v36 = vrot.slane %v4156_v14, 4  ;;  %v4198_v11 = vperm.slane %v1068_v34, %v3162_v27  ;;  %v1118_v2 = vsel %vm281_vm0, %v3887_v63, %v1117_v39  ;;  %v4205_v60 = vperm.slane %v1142_v61, %v3197_v54  ;;  %2697 = vrot.lane.b32.xlu1 %v2696_v17, %s3000_s11 }
 0x136   : > { %v1051_v13 = vrot.slane %v4152_v55, 4  ;;  %v1130_v34 = vsel %vm281_vm0, %v4177_v59, %v1129_v42  ;;  %v4213_v30 = vperm.slane %v1200_v0, %v3197_v54  ;;  %v4217_v48 = vperm.slane %v4001_v22, %v3162_v27 }
 0x137   : > { %v1201_v63 = vrot.slane %v1176_v26, 4  ;;  %v4222_v32 = vsel %vm281_vm0, %v1047_v38, %v3820_v16  ;;  %v4226_v39 = vsel %vm281_vm0, %v1159_v37, %v4187_v53  ;;  %v4231_v61 = vsel %vm281_vm0, %v4198_v11, %v1105_v36  ;;  %v4242_v37 = vpop.permute.xlu2 %2562 }
 0x138   : > { %v4234_v22 = vperm.slane %v1118_v2, %v3197_v54  ;;  %v1127_v26 = vrot.slane %v4177_v59, 4  ;;  %v4238_v6 = vperm.slane %v1130_v34, %v3197_v54  ;;  %v1163_v38 = vrot.slane %v4205_v60, 4 }
 0x139   : > { %v5117_v0 = vrot.slane %v3513_v46, 2  ;;  %v5118_v43 = vrot.slane %v3510_v45, 2  ;;  %v1594_v2 = vrot.slane %v3661_v10, 2  ;;  %v1761_v59 = vrot.slane %v4222_v32, 1 }
 0x13a   : > { %v1762_v34 = vrot.slane %v4226_v39, 1  ;;  %v1764_v42 = vrot.slane %v4213_v30, 1  ;;  %v5119_v49 = vrot.slane %v3470_v19, 2  ;;  %v5120_v17 = vrot.slane %v3467_v47, 2 }
 0x13b   : > { %v4249_v36 = vsel %vm1332_vm2, %v5118_v43, %v5117_v0  ;;  %v1189_v45 = vrot.slane %v4217_v48, 4  ;;  %v1202_v43 = vsel %vm281_vm0, %v4024_v52, %v1201_v63  ;;  %v5121_v10 = vmov %v5117_v0  ;;  %2722 = vrot.lane.b32.xlu0 %v2721_v56, %s3001_s20 }
 0x13c   : > { %v4260_v50 = vsel %vm1332_vm2, %v5120_v17, %v5119_v49  ;;  %v4268_v0 = vsel %vm1332_vm2, %v5121_v10, %v1594_v2  ;;  %v1584_v40 = vrot.slane %v5098_v44, 2  ;;  %v4273_v33 = vperm.slane %v3923_v7, %v3162_v27  ;;  %2717 = vrot.lane.b32.xlu2 %v2716_v21, %s3001_s20 }
 0x13d   : > { %v1529_v47 = vrot.slane %v4036_v9, 1  ;;  %v4278_v49 = vsel %vm281_vm0, %v1051_v13, %v4193_v5  ;;  %v2761_v52 = vpack.i.bf16 %v4268_v0, %v4249_v36  ;;  %v1617_v46 = vrot.slane %v4036_v9, 2 }
 0x13e   : > { %v1607_v63 = vrot.slane %v4030_v41, 2  ;;  %v4287_v27 = vsel %vm281_vm0, %v1163_v38, %v4234_v22  ;;  %v5122_v7 = vrot.slane %v3470_v19, 2  ;;  %v4295_v13 = vperm.slane %v1202_v43, %v3197_v54 }
 0x13f   : > { %v1763_v2 = vsel %vm1243_vm1, %v1761_v59, %v1762_v34  ;;  %v1765_v9 = vsel %vm1243_vm1, %v1762_v34, %v1764_v42  ;;  %v1528_v56 = vrot.slane %v4027_v20, 1  ;;  %v1616_v38 = vrot.slane %v4027_v20, 2 }
 0x140   : > { %v4292_v44 = vsel %vm1332_vm2, %v5122_v7, %v1584_v40  ;;  %v1606_v17 = vrot.slane %v4020_v29, 2  ;;  %v1771_v19 = vrot.slane %v4278_v49, 1  ;;  %v1859_v40 = vrot.slane %v4278_v49, 2  ;;  %v4334_v7 = vpop.permute.xlu2 %2577 }
 0x141   : > { %v2756_v41 = vpack.i.bf16 %v4292_v44, %v4260_v50  ;;  %v2731_v42 = vpack.i.bf16 %v4287_v27, %v4278_v49  ;;  %v1772_v59 = vrot.slane %v4287_v27, 1  ;;  %v886_v34 = vrot.slane %v4100_v58, 4 }
 0x142   : > { %v5123_v29 = vpack.i.bf16 %v4172_v3, %v4144_v4  ;;  %v2736_v20 = vpack.i.bf16 %v1765_v9, %v1763_v2  ;;  %v4319_v12 = vsel %vm1243_vm1, %v1528_v56, %v1529_v47  ;;  %v4322_v24 = vsel %vm1332_vm2, %v1616_v38, %v1617_v46 }
 0x143   : > { %v4325_v21 = vsel %vm1332_vm2, %v1606_v17, %v1607_v63  ;;  %v1860_v43 = vrot.slane %v4287_v27, 2  ;;  %v2726_v58 = vpack.i.bf16 %v4226_v39, %v4222_v32  ;;  %v887_v10 = vsel %vm281_vm0, 0.0, %v886_v34 }
 0x144   : > { %2712 = vrot.lane.b32.xlu1 %v5123_v29, %s3000_s11  ;;  %v1609_v4 = vrot.slane %v4136_v28, 2  ;;  %v1862_v3 = vrot.slane %v4295_v13, 2  ;;  %v1849_v49 = vrot.slane %v4222_v32, 2  ;;  %v1531_v2 = vrot.slane %v887_v10, 1  ;;  %2737 = vrot.lane.b32.xlu0 %v2736_v20, %s3002_s21 }
 0x145   : > { %v1619_v9 = vrot.slane %v887_v10, 2  ;;  %v5124_v27 = vrot.slane %v3447_v23, 2  ;;  %v5125_v38 = vrot.slane %v5100_v35, 2  ;;  %v1589_v28 = vrot.slane %v4060_v8, 2  ;;  %v5128_v10 = vld [vmem:[#allocation32_spill] sm:$0xff]  ;;  %2732 = vrot.lane.b32.xlu2 %v2731_v42, %s3003_s24 }
 0x146   : > { %v4337_v56 = vsel %vm1332_vm2, %v1607_v63, %v1609_v4  ;;  %v5126_v34 = vrot.slane %v3571_v51, 2  ;;  %v5127_v32 = vrot.slane %v3568_v1, 2  ;;  %v1850_v63 = vrot.slane %v4226_v39, 2 }
 0x147   : > { %v4344_v17 = vsel %vm1332_vm2, %v5125_v38, %v5124_v27  ;;  %v5129_v35 = vrot.slane %v3878_v62, 4  ;;  %v1128_v8 = vsel %vm281_vm0, %v1127_v26, %v3927_v18  ;;  %v4363_v27 = vsel %vm1243_vm1, %v1529_v47, %v1531_v2 }
 0x148   : > { %v4352_v29 = vsel %vm1332_vm2, %v5127_v32, %v5126_v34  ;;  %v1861_v1 = vsel %vm1332_vm2, %v1859_v40, %v1860_v43  ;;  %v1852_v38 = vrot.slane %v4213_v30, 2  ;;  %v2796_v20 = vpack.i.bf16 %v4363_v27, %v4319_v12  ;;  %v5131_v34 = vld [vmem:[#allocation23_spill] sm:$0xff]  ;;  %v5132_v32 = vld [vmem:[#allocation24_spill] sm:$0xff] }
 0x149   : > { %v1016_v4 = vsel %vm281_vm0, %v5129_v35, %v5128_v10  ;;  %v4370_v39 = vsel %vm1332_vm2, %v1617_v46, %v1619_v9  ;;  %v1863_v62 = vsel %vm1332_vm2, %v1860_v43, %v1862_v3  ;;  %v1774_v18 = vrot.slane %v4295_v13, 1 }
 0x14a   : > { %v2806_v26 = vpack.i.bf16 %v4370_v39, %v4322_v24  ;;  %v2801_v47 = vpack.i.bf16 %v4337_v56, %v4325_v21  ;;  %v4380_v40 = vperm.slane %v1016_v4, %v3197_v54  ;;  %v4383_v2 = vperm.slane %v1128_v8, %v3197_v54 }
 0x14b   : > { %v5130_v46 = vrot.slane %v3447_v23, 2  ;;  %v1599_v43 = vrot.slane %v4107_v31, 2  ;;  %v1187_v3 = vrot.slane %v4273_v33, 4  ;;  %v1190_v9 = vsel %vm281_vm0, %v4273_v33, %v1189_v45 }
 0x14c   : > { %2727 = vrot.lane.b32.xlu1 %v2726_v58, %s3003_s24  ;;  %v5133_v10 = vrot.slane %v5132_v32, 4  ;;  %v5134_v23 = vrot.slane %v4198_v11, 4  ;;  %v1851_v31 = vsel %vm1332_vm2, %v1849_v49, %v1850_v63  ;;  %v1853_v4 = vsel %vm1332_vm2, %v1850_v63, %v1852_v38  ;;  %v4426_v38 = vpop.permute.xlu0 %2567 }
 0x14d   : > { %v4388_v42 = vsel %vm1332_vm2, %v5130_v46, %v1589_v28  ;;  %v5135_v33 = vrot.slane %v3571_v51, 2  ;;  %v2751_v58 = vpack.i.bf16 %v1863_v62, %v1861_v1  ;;  %v1773_v46 = vsel %vm1243_vm1, %v1771_v19, %v1772_v59  ;;  %v2588_v62 = vpop.permute.xlu2 %2587 }
 0x14e   : > { %v992_v35 = vsel %vm281_vm0, %v5133_v10, %v5131_v34  ;;  %v1104_v28 = vsel %vm281_vm0, %v5134_v23, %v4156_v14  ;;  %v2841_v8 = vpack.i.bf16 %v4388_v42, %v4344_v17  ;;  %v1775_v34 = vsel %vm1243_vm1, %v1772_v59, %v1774_v18 }
 0x14f   : > { %v4412_v45 = vsel %vm1332_vm2, %v5135_v33, %v1599_v43  ;;  %v4419_v11 = vperm.slane %v992_v35, %v3197_v54  ;;  %v1039_v49 = vrot.slane %v4380_v40, 4  ;;  %v4423_v63 = vperm.slane %v1104_v28, %v3197_v54  ;;  %2752 = vrot.lane.b32.xlu0 %v2751_v58, %s3004_s27  ;;  %v5136_v28 = vld [vmem:[#allocation18_spill] sm:$0xff] }
 0x150   : > { %v2846_v14 = vpack.i.bf16 %v4412_v45, %v4352_v29  ;;  %v1151_v51 = vrot.slane %v4383_v2, 4  ;;  %v4430_v19 = vperm.slane %v4231_v61, %v3197_v54  ;;  %v1155_v59 = vrot.slane %v4238_v6, 4 }
 0x151   : > { %v2746_v1 = vpack.i.bf16 %v1853_v4, %v1851_v31  ;;  %v2590_v18 = vunpack.i.h.bf16 %v2588_v62  ;;  %v2589_v43 = vunpack.i.l.bf16 %v2588_v62  ;;  %v1188_v32 = vsel %vm281_vm0, %v1187_v3, %v4217_v48  ;;  %v5137_v4 = vld [vmem:[#allocation20_spill] sm:$0xff]  ;;  %v5138_v48 = vld [vmem:[#allocation29_spill] sm:$0xff]  ;;  %v4464_v62 = vpop.permute.xlu1 %2572 }
 0x152   : > { %v4437_v10 = vperm.slane %v1190_v9, %v3197_v54  ;;  %v2741_v61 = vpack.i.bf16 %v1775_v34, %v1773_v46  ;;  %v1040_v35 = vsel %vm281_vm0, %v1039_v49, %v4419_v11  ;;  %v1152_v23 = vsel %vm281_vm0, %v1151_v51, %v4423_v63 }
 0x153   : > { %2747 = vrot.lane.b32.xlu2 %v2746_v1, %s3004_s27  ;;  %v4446_v31 = vsel %vm1917_vm3, %v5136_v28, %v2590_v18  ;;  %v4450_v33 = vsel %vm1917_vm3, %v5137_v4, %v2589_v43  ;;  %v5139_v3 = vrot.slane %v4148_v57, 4  ;;  %v1156_v58 = vsel %vm281_vm0, %v1155_v59, %v4430_v19 }
 0x154   : > { %2742 = vrot.lane.b32.xlu1 %v2741_v61, %s3002_s21  ;;  %v4460_v46 = vperm.slane %v1188_v32, %v3197_v54  ;;  %v2766_v34 = vpack.i.bf16 %v1152_v23, %v1040_v35  ;;  %v1752_v51 = vrot.slane %v1156_v58, 1  ;;  %v1754_v1 = vrot.slane %v4437_v10, 1 }
 0x155   : > { %v1044_v9 = vsel %vm281_vm0, %v5139_v3, %v5138_v48  ;;  %v1741_v18 = vrot.slane %v1040_v35, 1  ;;  %v1742_v43 = vrot.slane %v1152_v23, 1  ;;  %v4467_v28 = vpop.permute.xlu0 %2592  ;;  %v1829_v50 = vrot.slane %v1040_v35, 2 }
 0x156   : > { %v1751_v49 = vrot.slane %v1044_v9, 1  ;;  %v1744_v61 = vrot.slane %v4460_v46, 1  ;;  %v1755_v59 = vsel %vm1243_vm1, %v1752_v51, %v1754_v1  ;;  %v1839_v0 = vrot.slane %v1044_v9, 2 }
 0x157   : > { %2767 = vrot.lane.b32.xlu0 %v2766_v34, %s3003_s24  ;;  %v1743_v32 = vsel %vm1243_vm1, %v1741_v18, %v1742_v43  ;;  %v4481_v34 = vpop.permute.xlu2 %2602  ;;  %v1830_v44 = vrot.slane %v1152_v23, 2  ;;  %v1215_v12 = vrot.slane %v4213_v30, 4  ;;  %v2565_v56 = vunpack.i.h.bf16 %v4242_v37 }
 0x158   : > { %v1753_v54 = vsel %vm1243_vm1, %v1751_v49, %v1752_v51  ;;  %v1745_v4 = vsel %vm1243_vm1, %v1742_v43, %v1744_v61  ;;  %v1842_v49 = vrot.slane %v4437_v10, 2  ;;  %v2771_v51 = vpack.i.bf16 %v1156_v58, %v1044_v9 }
 0x159   : > { %v2781_v3 = vpack.i.bf16 %v1755_v59, %v1753_v54  ;;  %v2776_v36 = vpack.i.bf16 %v1745_v4, %v1743_v32  ;;  %v1049_v54 = vrot.slane %v3820_v16, 4  ;;  %v1161_v59 = vrot.slane %v4187_v53, 4 }
 0x15a   : > { %v1053_v32 = vrot.slane %v4193_v5, 4  ;;  %v1165_v9 = vrot.slane %v4234_v22, 4  ;;  %v1831_v35 = vsel %vm1332_vm2, %v1829_v50, %v1830_v44 }
 0x15b   : > { %2762 = vrot.lane.b32.xlu2 %v2761_v52, %s3001_s20  ;;  %v1840_v52 = vrot.slane %v1156_v58, 2  ;;  %v2583_v1 = vpop.permute.xlu1 %2582  ;;  %v1217_v58 = vrot.slane %v4295_v13, 4  ;;  %v4507_v16 = vsel %vm281_vm0, %v3911_v25, %v1049_v54  ;;  %v4511_v53 = vsel %vm281_vm0, %v4119_v15, %v1161_v59  ;;  %v5142_v54 = vld [vmem:[#allocation22_spill] sm:$0xff] }
 0x15c   : > { %2757 = vrot.lane.b32.xlu1 %v2756_v41, %s3001_s20  ;;  %v1832_v41 = vrot.slane %v4460_v46, 2  ;;  %v4516_v22 = vsel %vm281_vm0, %v4152_v55, %v1053_v32  ;;  %v4520_v13 = vsel %vm281_vm0, %v4205_v60, %v1165_v9  ;;  %v2585_v27 = vunpack.i.h.bf16 %v2583_v1  ;;  %v5143_v32 = vld [vmem:[#allocation21_spill] sm:$0xff] }
 0x15d   : > { %v1841_v43 = vsel %vm1332_vm2, %v1839_v0, %v1840_v52  ;;  %v1843_v61 = vsel %vm1332_vm2, %v1840_v52, %v1842_v49  ;;  %v2584_v25 = vunpack.i.l.bf16 %v2583_v1  ;;  %v2811_v15 = vpack.i.bf16 %v4511_v53, %v4507_v16 }
 0x15e   : > { %v1833_v23 = vsel %vm1332_vm2, %v1830_v44, %v1832_v41  ;;  %v2791_v4 = vpack.i.bf16 %v1843_v61, %v1841_v43  ;;  %v1776_v52 = vrot.slane %v4516_v22, 1  ;;  %v1777_v60 = vrot.slane %v4520_v13, 1  ;;  %v5140_v44 = vld [vmem:[#allocation14_spill] sm:$0xff]  ;;  %v5141_v43 = vld [vmem:[#allocation13_spill] sm:$0xff] }
 0x15f   : > { %2782 = vrot.lane.b32.xlu0 %v2781_v3, %s3002_s21  ;;  %v4487_v18 = vpop.permute.xlu0 %2607  ;;  %v2786_v5 = vpack.i.bf16 %v1833_v23, %v1831_v35  ;;  %v1919_v41 = vsel %vm1917_vm3, %v5140_v44, %v2585_v27  ;;  %v1918_v61 = vsel %vm1917_vm3, %v5141_v43, %v2584_v25  ;;  %v2595_v35 = vunpack.i.h.bf16 %v4467_v28 }
 0x160   : > { %v2594_v23 = vunpack.i.l.bf16 %v4467_v28  ;;  %v1767_v27 = vrot.slane %v4511_v53, 1  ;;  %v2610_v44 = vunpack.i.h.bf16 %v4487_v18 }
 0x162   : > { %v4503_v3 = vpop.permute.xlu2 %2617 }
 0x163   : > { %2777 = vrot.lane.b32.xlu2 %v2776_v36, %s3002_s21 }
 0x164   : > { %2772 = vrot.lane.b32.xlu1 %v2771_v51, %s3003_s24  ;;  %v4533_v51 = vsel %vm281_vm0, 0.0, %v1215_v12  ;;  %v1766_v12 = vrot.slane %v4507_v16, 1 }
 0x167   : > { %2797 = vrot.lane.b32.xlu0 %v2796_v20, %s3000_s11  ;;  %v4524_v20 = vsel %vm281_vm0, 0.0, %v1217_v58  ;;  %s2360_s11 = sshll.u32 %s2960_s15, 4 }
 0x168   : > { %v2598_v36 = vpop.permute.xlu1 %2597  ;;  %v1779_v30 = vrot.slane %v4524_v20, 1 }
 0x169   : > { %v2600_v55 = vunpack.i.h.bf16 %v2598_v36  ;;  %v2599_v0 = vunpack.i.l.bf16 %v2598_v36  ;;  %v2623_v49 = vpop.permute.xlu0 %2622  ;;  %v1778_v36 = vsel %vm1243_vm1, %v1776_v52, %v1777_v60 }
 0x16a   : > { %v2625_v1 = vunpack.i.h.bf16 %v2623_v49  ;;  %v2624_v50 = vunpack.i.l.bf16 %v2623_v49 }
 0x16b   : > { %2792 = vrot.lane.b32.xlu2 %v2791_v4, %s3004_s27  ;;  %v1925_v59 = vsel %vm1917_vm3, %v5142_v54, %v2600_v55  ;;  %v1924_v9 = vsel %vm1917_vm3, %v5143_v32, %v2599_v0  ;;  %v2633_v28 = vpop.permute.xlu2 %2632  ;;  %v1780_v55 = vsel %vm1243_vm1, %v1777_v60, %v1779_v30  ;;  %v5144_v0 = vld [vmem:[#allocation12_spill] sm:$0xff]  ;;  %v1768_v60 = vsel %vm1243_vm1, %v1766_v12, %v1767_v27 }
 0x16c   : > { %2787 = vrot.lane.b32.xlu1 %v2786_v5, %s3004_s27  ;;  %v4547_v58 = vsel %vm1934_vm4, %v1919_v41, %v2625_v1  ;;  %v4550_v4 = vsel %vm1934_vm4, %v1918_v61, %v2624_v50  ;;  %v1769_v5 = vrot.slane %v4533_v51, 1  ;;  %v2635_v25 = vunpack.i.h.bf16 %v2633_v28  ;;  %v5145_v1 = vld [vmem:[#allocation11_spill] sm:$0xff] }
 0x16d   : > { %v1923_v49 = vsel %vm1917_vm3, %v5144_v0, %v2595_v35  ;;  %v1922_v50 = vsel %vm1917_vm3, %v5145_v1, %v2594_v23  ;;  %v2826_v52 = vpack.i.bf16 %v1780_v55, %v1778_v36  ;;  %v1213_v30 = vrot.slane %v4437_v10, 4  ;;  %v5146_v36 = vld [vmem:[#allocation16_spill] sm:$0xff]  ;;  %v5147_v55 = vld [vmem:[#allocation15_spill] sm:$0xff] }
 0x16e   : > { %v1940_v24 = vsel %vm1934_vm4, %v1923_v49, %v2635_v25  ;;  %v2609_v41 = vunpack.i.l.bf16 %v4487_v18  ;;  %v1865_v61 = vrot.slane %v4520_v13, 2  ;;  %v1867_v54 = vrot.slane %v4524_v20, 2 }
 0x16f   : > { %2812 = vrot.lane.b32.xlu0 %v2811_v15, %s3003_s24  ;;  %v2634_v15 = vunpack.i.l.bf16 %v2633_v28  ;;  %v1854_v35 = vrot.slane %v4507_v16, 2  ;;  %v2816_v18 = vpack.i.bf16 %v4520_v13, %v4516_v22  ;;  %v1929_v20 = vsel %vm1917_vm3, %v5146_v36, %v2610_v44 }
 0x170   : > { %v1928_v16 = vsel %vm1917_vm3, %v5147_v55, %v2609_v41  ;;  %v1868_v49 = vsel %vm1332_vm2, %v1865_v61, %v1867_v54  ;;  %v2564_v1 = vunpack.i.l.bf16 %v4242_v37 }
 0x171   : > { %v1939_v39 = vsel %vm1934_vm4, %v1922_v50, %v2634_v15  ;;  %v1857_v15 = vrot.slane %v4533_v51, 2  ;;  %v1045_v50 = vrot.slane %v5138_v48, 4  ;;  %v1153_v48 = vrot.slane %v4423_v63, 4 }
 0x172   : > { %v4577_v21 = vpop.permute.xlu1 %2612 }
 0x173   : > { %2807 = vrot.lane.b32.xlu2 %v2806_v26, %s3001_s20  ;;  %v1770_v26 = vsel %vm1243_vm1, %v1767_v27, %v1769_v5  ;;  %v2638_v32 = vpop.permute.xlu0 %2637  ;;  %v2648_v23 = vpop.permute.xlu2 %2647  ;;  %v1855_v27 = vrot.slane %v4511_v53, 2  ;;  %v4627_v17 = vsel %vm281_vm0, %v4148_v57, %v1045_v50 }
 0x174   : > { %2802 = vrot.lane.b32.xlu1 %v2801_v47, %s3001_s20  ;;  %v2821_v43 = vpack.i.bf16 %v1770_v26, %v1768_v60  ;;  %v1864_v47 = vrot.slane %v4516_v22, 2  ;;  %v2640_v5 = vunpack.i.h.bf16 %v2638_v32  ;;  %v2639_v12 = vunpack.i.l.bf16 %v2638_v32 }
 0x175   : > { %v2650_v28 = vunpack.i.h.bf16 %v2648_v23  ;;  %v2649_v25 = vunpack.i.l.bf16 %v2648_v23  ;;  %v1041_v26 = vrot.slane %v4419_v11, 4  ;;  %v2575_v60 = vunpack.i.h.bf16 %v4464_v62 }
 0x176   : > { %v4595_v0 = vsel %vm1934_vm4, %v1925_v59, %v2640_v5  ;;  %v4598_v22 = vsel %vm1934_vm4, %v1924_v9, %v2639_v12  ;;  %v1866_v51 = vsel %vm1332_vm2, %v1864_v47, %v1865_v61  ;;  %v1157_v59 = vrot.slane %v4430_v19, 4 }
 0x177   : > { %2827 = vrot.lane.b32.xlu0 %v2826_v52, %s3002_s21  ;;  %v4601_v53 = vsel %vm1934_vm4, %v1929_v20, %v2650_v28  ;;  %v4604_v13 = vsel %vm1934_vm4, %v1928_v16, %v2649_v25  ;;  %v2570_v9 = vunpack.i.h.bf16 %v4426_v38  ;;  %v2569_v52 = vunpack.i.l.bf16 %v4426_v38 }
 0x178   : > { %v1858_v44 = vsel %vm1332_vm2, %v1855_v27, %v1857_v15  ;;  %v2836_v37 = vpack.i.bf16 %v1868_v49, %v1866_v51  ;;  %v1211_v11 = vrot.slane %v4460_v46, 4  ;;  %v2574_v19 = vunpack.i.l.bf16 %v4464_v62 }
 0x179   : > { %v1856_v38 = vsel %vm1332_vm2, %v1854_v35, %v1855_v27  ;;  %v4631_v42 = vsel %vm281_vm0, %v4238_v6, %v1157_v59  ;;  %v4643_v54 = vsel %vm1951_vm5, %v1940_v24, %v2575_v60  ;;  %v1154_v6 = vsel %vm281_vm0, %v4383_v2, %v1153_v48 }
 0x17a   : > { %v2628_v41 = vpop.permute.xlu1 %2627  ;;  %v2831_v61 = vpack.i.bf16 %v1858_v44, %v1856_v38  ;;  %v4640_v62 = vsel %vm1951_vm5, %v1939_v39, %v2574_v19  ;;  %v1212_v32 = vsel %vm281_vm0, 0.0, %v1211_v11  ;;  %v2856_v24 = vpack.i.bf16 %v4631_v42, %v4627_v17 }
 0x17b   : > { %2822 = vrot.lane.b32.xlu2 %v2821_v43, %s3002_s21  ;;  %v2630_v43 = vunpack.i.h.bf16 %v2628_v41  ;;  %v2629_v47 = vunpack.i.l.bf16 %v2628_v41  ;;  %v4660_v39 = vsel %vm1951_vm5, %v4550_v4, %v2564_v1  ;;  %v4664_v2 = vsel %vm1951_vm5, %v4547_v58, %v2565_v56 }
 0x17c   : > { %2817 = vrot.lane.b32.xlu1 %v2816_v18, %s3003_s24  ;;  %v1835_v18 = vrot.slane %v1154_v6, 2  ;;  %v1837_v23 = vrot.slane %v1212_v32, 2  ;;  %v1756_v5 = vrot.slane %v4627_v17, 1  ;;  %v1757_v10 = vrot.slane %v4631_v42, 1 }
 0x17d   : > { %v1938_v63 = vsel %vm1934_vm4, %v4446_v31, %v2630_v43  ;;  %v1937_v46 = vsel %vm1934_vm4, %v4450_v33, %v2629_v47  ;;  %v1214_v33 = vsel %vm281_vm0, 0.0, %v1213_v30  ;;  %v2580_v4 = vunpack.i.h.bf16 %v4334_v7 }
 0x17e   : > { %v4646_v57 = vpop.permute.xlu2 %2672  ;;  %v1955_v31 = vsel %vm1951_vm5, %v1938_v63, %v2570_v9  ;;  %v4669_v12 = vpop.permute.xlu0 %2652  ;;  %v1759_v27 = vrot.slane %v1214_v33, 1  ;;  %v2579_v28 = vunpack.i.l.bf16 %v4334_v7  ;;  %v1747_v58 = vrot.slane %v1154_v6, 1 }
 0x17f   : > { %2842 = vrot.lane.b32.xlu0 %v2841_v8, %s3001_s20  ;;  %v1042_v8 = vsel %vm281_vm0, %v4380_v40, %v1041_v26  ;;  %v1954_v40 = vsel %vm1951_vm5, %v1937_v46, %v2569_v52  ;;  %v1838_v15 = vsel %vm1332_vm2, %v1835_v18, %v1837_v23  ;;  %v1749_v36 = vrot.slane %v1212_v32, 1 }
 0x180   : > { %v1834_v35 = vrot.slane %v1042_v8, 2  ;;  %v2851_v30 = vpack.i.bf16 %v1154_v6, %v1042_v8  ;;  %v1746_v25 = vrot.slane %v1042_v8, 1  ;;  %v1758_v55 = vsel %vm1243_vm1, %v1756_v5, %v1757_v10 }
 0x181   : > { %v1760_v7 = vsel %vm1243_vm1, %v1757_v10, %v1759_v27  ;;  %v4684_v49 = vsel %vm1951_vm5, %v4598_v22, %v2579_v28  ;;  %v4688_v1 = vsel %vm1951_vm5, %v4595_v0, %v2580_v4  ;;  %v1750_v26 = vsel %vm1243_vm1, %v1747_v58, %v1749_v36 }
 0x182   : > { %v1836_v56 = vsel %vm1332_vm2, %v1834_v35, %v1835_v18  ;;  %v1748_v59 = vsel %vm1243_vm1, %v1746_v25, %v1747_v58  ;;  %v2866_v22 = vpack.i.bf16 %v1760_v7, %v1758_v55  ;;  %v1844_v52 = vrot.slane %v4627_v17, 2  ;;  %v2366_v25 = vld [vmem:[%s5003_s1 + $0x8] sm:$0xff] }
 0x183   : > { %2837 = vrot.lane.b32.xlu2 %v2836_v37, %s3004_s27  ;;  %v2871_v29 = vpack.i.bf16 %v1838_v15, %v1836_v56  ;;  %v2861_v9 = vpack.i.bf16 %v1750_v26, %v1748_v59  ;;  %v1845_v60 = vrot.slane %v4631_v42, 2  ;;  %v1847_v44 = vrot.slane %v1214_v33, 2  ;;  %v5149_v42 = vld [vmem:[#allocation30_spill] sm:$0xff]  ;;  %v2365_v56 = vld [vmem:[%s5003_s1] sm:$0xff] }
 0x184   : > { %2832 = vrot.lane.b32.xlu1 %v2831_v61, %s3004_s27  ;;  %v2620_v37 = vunpack.i.h.bf16 %v4503_v3  ;;  %v2619_v41 = vunpack.i.l.bf16 %v4503_v3  ;;  %v5148_v61 = vld [vmem:[#allocation31_spill] sm:$0xff] }
 0x185   : > { %v1846_v43 = vsel %vm1332_vm2, %v1844_v52, %v1845_v60  ;;  %v1848_v47 = vsel %vm1332_vm2, %v1845_v60, %v1847_v44  ;;  %v2604_v52 = vunpack.i.l.bf16 %v4481_v34  ;;  %v2655_v60 = vunpack.i.h.bf16 %v4669_v12 }
 0x186   : > { %v2688_v20 = vpop.permute.xlu2 %2687  ;;  %v1933_v17 = vsel %vm1917_vm3, %v5148_v61, %v2620_v37  ;;  %v1932_v8 = vsel %vm1917_vm3, %v5149_v42, %v2619_v41  ;;  %v2876_v6 = vpack.i.bf16 %v1848_v47, %v1846_v43  ;;  %v5152_v47 = vld [vmem:[#allocation25_spill] sm:$0xff]  ;;  %v2614_v61 = vunpack.i.l.bf16 %v4577_v21 }
 0x187   : > { %2857 = vrot.lane.b32.xlu0 %v2856_v24, %s3003_s24  ;;  %v2690_v16 = vunpack.i.h.bf16 %v2688_v20  ;;  %v2689_v51 = vunpack.i.l.bf16 %v2688_v20  ;;  %v4690_v50 = vpop.permute.xlu1 %2642 }
 0x188   : > { %v2645_v44 = vunpack.i.h.bf16 %v4690_v50 }
 0x189   : > { %v4693_v45 = vsel %vm1968_vm6, %v1955_v31, %v2690_v16 }
 0x18b   : > { %2852 = vrot.lane.b32.xlu2 %v2851_v30, %s3003_s24 }
 0x18c   : > { %2847 = vrot.lane.b32.xlu1 %v2846_v14, %s3001_s20  ;;  %v4696_v14 = vsel %vm1968_vm6, %v1954_v40, %v2689_v51  ;;  %v4702_v0 = vpop.permute.xlu0 %2657  ;;  %v2065_v40 = vld [vmem:[%s5003_s1 + $0x10] sm:$0x3]  ;;  %s2361_s20 = sshll.u32 %s2964_s16, 5  ;;  %s2211_s16 = sshll.u32 %s4922_s22, 4  ;;  %s2212_s16 = int_to_ptr.vmem [resolvable:$true] %s2211_s16 }
 0x18d   : > { %v2079_v33 = vunpack.c.l.b16 %v2065_v40  ;;  %v2660_v37 = vunpack.i.h.bf16 %v4702_v0 }
 0x18e   : > { %v4709_v48 = vpop.permute.xlu2 %2702 }
 0x18f   : > { %2872 = vrot.lane.b32.xlu0 %v2871_v29, %s3004_s27  ;;  %v2663_v11 = vpop.permute.xlu1 %2662  ;;  %v2082_v5 = vpack.c.b16 %v2079_v33, %v2079_v33  ;;  %v2674_v33 = vunpack.i.l.bf16 %v4646_v57 }
 0x190   : > { %v2665_v19 = vunpack.i.h.bf16 %v2663_v11  ;;  %v2664_v38 = vunpack.i.l.bf16 %v2663_v11  ;;  %v5150_v11 = vld [vmem:[#allocation26_spill] sm:$0xff] }
 0x191   : > { %v2112_v27 = vsel %vm2110_vm7, %v2082_v5, 0 }
 0x192   : > { %v1949_v63 = vsel %vm1934_vm4, %v1932_v8, %v2664_v38  ;;  %v1950_v3 = vsel %vm1934_vm4, %v1933_v17, %v2665_v19  ;;  %2368 = vmatpush.bf16.msra.mxu2 %v2112_v27  ;;  %2369 = vmatpush.bf16.msra.mxu3 %v2112_v27  ;;  %v5151_v38 = vld [vmem:[#allocation28_spill] sm:$0xff]  ;;  %v2705_v8 = vunpack.i.h.bf16 %v4709_v48 }
 0x193   : > { %2867 = vrot.lane.b32.xlu2 %v2866_v22, %s3002_s21  ;;  %2367 = vmatpush.bf16.msra.mxu1 %v2112_v27  ;;  %v2605_v22 = vunpack.i.h.bf16 %v4481_v34  ;;  %v1926_v34 = vsel %vm1917_vm3, %v5152_v47, %v2604_v52 }
 0x194   : > { %2862 = vrot.lane.b32.xlu1 %v2861_v9, %s3002_s21  ;;  %2119 = vmatpush.bf16.msra.mxu0 %v2112_v27  ;;  %v2615_v9 = vunpack.i.h.bf16 %v4577_v21  ;;  %s2208_s21 = sadd.s32 %s2361_s20, %s2360_s11 }
 0x195   : > { %v2678_v46 = vpop.permute.xlu0 %2677  ;;  %v1927_v19 = vsel %vm1917_vm3, %v5150_v11, %v2605_v22  ;;  %s2362_s24 = sshll.u32 %s2208_s21, 3 }
 0x196   : > { %v2680_v31 = vunpack.i.h.bf16 %v2678_v46  ;;  %v2679_v32 = vunpack.i.l.bf16 %v2678_v46  ;;  %v4729_v18 = vpop.permute.xlu2 %2717  ;;  %2371 = vmatpush.bf16.msra.mxu2 %v2366_v25  ;;  %2372 = vmatpush.bf16.msra.mxu3 %v2366_v25  ;;  %v1931_v43 = vsel %vm1917_vm3, %v5151_v38, %v2615_v9  ;;  %s2210_s15 = scalar_lea.hbm %s5005_s3, %s2362_s24 }
 0x197   : > { %v2668_v23 = vpop.permute.xlu1 %2667  ;;  %2370 = vmatpush.bf16.msra.mxu1 %v2366_v25  ;;  %v1948_v17 = vsel %vm1934_vm4, %v1931_v43, %v2655_v60  ;;  %v2719_v21 = vunpack.i.l.bf16 %v4729_v18  ;;  %s2213_s29 = sshll.u32 %s2210_s15, 4  ;;  %s2214_s29 = int_to_ptr.hbm [resolvable:$true] %s2213_s29 }
 0x198   : > { %v4724_v24 = vsel %vm1951_vm5, %v1949_v63, %v2679_v32  ;;  %v4727_v35 = vsel %vm1951_vm5, %v1950_v3, %v2680_v31  ;;  %v2670_v10 = vunpack.i.h.bf16 %v2668_v23  ;;  %v2669_v30 = vunpack.i.l.bf16 %v2668_v23  ;;  %2120 = vmatpush.bf16.msra.mxu0 %v2366_v25  ;;  %s2896_s5 = sshra.s32 %s2214_s29, 4  ;;  %s2897_s5 = int_to_ptr.hbm [resolvable:$true] %s2896_s5 }
 0x199   : > { %v2704_v63 = vunpack.i.l.bf16 %v4709_v48  ;;  %v2675_v31 = vunpack.i.h.bf16 %v4646_v57  ;;  %s2898_s6 = scalar_lea.hbm %s2897_s5, 128  ;;  %p2903_p2 = scmp.lt.s32.totalorder %s2897_s5, %s5005_s3 }
 0x19a   : > { %v1962_v4 = vsel %vm1951_vm5, %v4604_v13, %v2669_v30  ;;  %v4735_v28 = vsel %vm1951_vm5, %v4601_v53, %v2670_v10  ;;  %2374 = vmatpush.bf16.msra.mxu2 %v2365_v56  ;;  %2375 = vmatpush.bf16.msra.mxu3 %v2365_v56  ;;  %p2899_p13 = scmp.ne.s32.totalorder %s2897_s5, %s2898_s6  ;;  %p2904_p4 = scmp.lt.s32.totalorder %s2902_s10, %s2898_s6 }
 0x19b   : > { %2373 = vmatpush.bf16.msra.mxu1 %v2365_v56  ;;  %v1965_v30 = vsel %vm1951_vm5, %v1948_v17, %v2675_v31 }
 0x19c   : > { %2877 = vrot.lane.b32.xlu1 %v2876_v6, %s3004_s27  ;;  %2121 = vmatpush.bf16.msra.mxu0 %v2365_v56  ;;  %v2720_v6 = vunpack.i.h.bf16 %v4729_v18  ;;  %p2900_p0 = pnand %p2899_p13, %p3077_p3  ;;  %p2905_p5 = por %p2904_p4, %p2903_p2 }
 0x19d   : > { %v4740_v58 = vpop.permute.xlu0 %2692 }
 0x19e   : > { %p2901_p1 = pneg %p2900_p0 }
 0x19f   : > { %v4745_v13 = vpop.permute.xlu1 %2682  ;;  %v4747_v53 = vpop.permute.xlu2 %2732 }
 0x1a0   : > { %v2734_v17 = vunpack.i.l.bf16 %v4747_v53  ;;  %p2906_p6 = pnand %p2905_p5, %p2901_p1 }
 0x1a5   : > { %v4749_v15 = vpop.permute.xlu0 %2707 }
 0x1a6   : > { %v2709_v36 = vunpack.i.l.bf16 %v4749_v15 }
 0x1a7   : > { %v2698_v55 = vpop.permute.xlu1 %2697 }
 0x1a8   : > { %v4753_v20 = vsel %vm1968_vm6, %v1962_v4, %v2709_v36  ;;  %v2700_v7 = vunpack.i.h.bf16 %v2698_v55  ;;  %v2699_v16 = vunpack.i.l.bf16 %v2698_v55  ;;  %v2710_v36 = vunpack.i.h.bf16 %v4749_v15 }
 0x1aa   : > { %v4757_v51 = vsel %vm1968_vm6, %v4688_v1, %v2700_v7  ;;  %v4761_v29 = vsel %vm1968_vm6, %v4684_v49, %v2699_v16  ;;  %v2644_v1 = vunpack.i.l.bf16 %v4690_v50  ;;  %v2659_v49 = vunpack.i.l.bf16 %v4702_v0 }
 0x1ab   : > { %v2654_v50 = vunpack.i.l.bf16 %v4669_v12  ;;  %v1944_v0 = vsel %vm1934_vm4, %v1927_v19, %v2645_v44  ;;  %v5153_v12 = vld [vmem:[#allocation27_spill] sm:$0xff] }
 0x1ac   : > { %v1943_v42 = vsel %vm1934_vm4, %v1926_v34, %v2644_v1  ;;  %v1961_v46 = vsel %vm1951_vm5, %v1944_v0, %v2660_v37  ;;  %v1930_v32 = vsel %vm1917_vm3, %v5153_v12, %v2614_v61  ;;  %v2735_v61 = vunpack.i.h.bf16 %v4747_v53 }
 0x1ad   : > { %v2748_v59 = vpop.permute.xlu2 %2747  ;;  %v4763_v26 = vpop.permute.xlu0 %2722  ;;  %v1960_v3 = vsel %vm1951_vm5, %v1943_v42, %v2659_v49  ;;  %v1947_v48 = vsel %vm1934_vm4, %v1930_v32, %v2654_v50  ;;  %v1978_v10 = vsel %vm1968_vm6, %v1961_v46, %v2705_v8 }
 0x1ae   : > { %v1977_v5 = vsel %vm1968_vm6, %v1960_v3, %v2704_v63  ;;  %v1995_v27 = vsel %vm1985_vm8, %v1978_v10, %v2720_v6  ;;  %v2750_v55 = vunpack.i.h.bf16 %v2748_v59  ;;  %v2749_v22 = vunpack.i.l.bf16 %v2748_v59 }
 0x1af   : > { %v1994_v18 = vsel %vm1985_vm8, %v1977_v5, %v2719_v21  ;;  %v2724_v9 = vunpack.i.l.bf16 %v4763_v26  ;;  %v1964_v44 = vsel %vm1951_vm5, %v1947_v48, %v2674_v33  ;;  %v2725_v15 = vunpack.i.h.bf16 %v4763_v26 }
 0x1b0   : > { %v1981_v38 = vsel %vm1968_vm6, %v1964_v44, %v2710_v36  ;;  %v2695_v48 = vunpack.i.h.bf16 %v4740_v58  ;;  %v2694_v5 = vunpack.i.l.bf16 %v4740_v58 }
 0x1b1   : > { %v1998_v47 = vsel %vm1985_vm8, %v1981_v38, %v2724_v9 }
 0x1b2   : > { %v2015_v3 = vsel %vm2002_vm9, %v1998_v47, %v2734_v17 }
 0x1b5   : > { %v4796_v23 = vpop.permute.xlu2 %2762 }
 0x1b6   : > { %v4773_v41 = vpop.permute.xlu1 %2712  ;;  %v2738_v40 = vpop.permute.xlu0 %2737 }
 0x1b7   : > { %v2714_v4 = vunpack.i.l.bf16 %v4773_v41  ;;  %v2740_v7 = vunpack.i.h.bf16 %v2738_v40  ;;  %v2739_v16 = vunpack.i.l.bf16 %v2738_v40 }
 0x1b9   : > { %v1982_v1 = vsel %vm1968_vm6, %v1965_v30, %v2714_v4  ;;  %v2685_v30 = vunpack.i.h.bf16 %v4745_v13  ;;  %v2764_v4 = vunpack.i.l.bf16 %v4796_v23 }
 0x1ba   : > { %v1999_v34 = vsel %vm1985_vm8, %v1982_v1, %v2725_v15 }
 0x1bb   : > { %v2016_v46 = vsel %vm2002_vm9, %v1999_v34, %v2735_v61  ;;  %v1970_v58 = vsel %vm1968_vm6, %v4664_v2, %v2685_v30 }
 0x1bd   : > { %v4821_v50 = vpop.permute.xlu2 %2777 }
 0x1be   : > { %v2728_v25 = vpop.permute.xlu1 %2727  ;;  %v2780_v61 = vunpack.i.h.bf16 %v4821_v50  ;;  %v2779_v17 = vunpack.i.l.bf16 %v4821_v50 }
 0x1bf   : > { %v2730_v56 = vunpack.i.h.bf16 %v2728_v25  ;;  %v2729_v57 = vunpack.i.l.bf16 %v2728_v25  ;;  %v1973_v25 = vsel %vm1968_vm6, %v4640_v62, %v2694_v5 }
 0x1c1   : > { %v2011_v52 = vsel %vm2002_vm9, %v1994_v18, %v2729_v57  ;;  %v2012_v60 = vsel %vm2002_vm9, %v1995_v27, %v2730_v56  ;;  %v2753_v37 = vpop.permute.xlu0 %2752  ;;  %v2684_v18 = vunpack.i.l.bf16 %v4745_v13  ;;  %v2765_v27 = vunpack.i.h.bf16 %v4796_v23 }
 0x1c2   : > { %v2028_v49 = vsel %vm2019_vm10, %v2011_v52, %v2739_v16  ;;  %v2029_v11 = vsel %vm2019_vm10, %v2012_v60, %v2740_v7  ;;  %v2755_v8 = vunpack.i.h.bf16 %v2753_v37  ;;  %v2754_v63 = vunpack.i.l.bf16 %v2753_v37 }
 0x1c3   : > { %v2045_v19 = vsel %vm2036_vm11, %v2028_v49, %v2749_v22  ;;  %v2046_v59 = vsel %vm2036_vm11, %v2029_v11, %v2750_v55  ;;  %v1974_v56 = vsel %vm1968_vm6, %v4643_v54, %v2695_v48  ;;  %v1969_v7 = vsel %vm1968_vm6, %v4660_v39, %v2684_v18 }
 0x1c4   : > { %v2057_v43 = vpack.c.bf16 %v2046_v59, %v2045_v19  ;;  %v1990_v22 = vsel %vm1985_vm8, %v1973_v25, %v2764_v4  ;;  %v1991_v23 = vsel %vm1985_vm8, %v1974_v56, %v2765_v27 }
 0x1c5   : > { %v2793_v33 = vpop.permute.xlu2 %2792 }
 0x1c6   : > { %v2743_v42 = vpop.permute.xlu1 %2742  ;;  %2355 = vmatmul.msk.bf16.vlgmr.msra.gmra.mxu2 %vm2085_vm12, %v2057_v43  ;;  %v2795_v52 = vunpack.i.h.bf16 %v2793_v33  ;;  %v2794_v60 = vunpack.i.l.bf16 %v2793_v33 }
 0x1c7   : > { %v2745_v26 = vunpack.i.h.bf16 %v2743_v42  ;;  %v2744_v0 = vunpack.i.l.bf16 %v2743_v42 }
 0x1c9   : > { %v2032_v6 = vsel %vm2019_vm10, %v2015_v3, %v2744_v0  ;;  %v2033_v21 = vsel %vm2019_vm10, %v2016_v46, %v2745_v26  ;;  %v2768_v40 = vpop.permute.xlu0 %2767 }
 0x1ca   : > { %v2049_v53 = vsel %vm2036_vm11, %v2032_v6, %v2754_v63  ;;  %v2050_v31 = vsel %vm2036_vm11, %v2033_v21, %v2755_v8  ;;  %v2770_v15 = vunpack.i.h.bf16 %v2768_v40  ;;  %v2769_v19 = vunpack.i.l.bf16 %v2768_v40 }
 0x1cb   : > { %v2059_v12 = vpack.c.bf16 %v2050_v31, %v2049_v53 }
 0x1cd   : > { %2357 = vmatmul.msk.bf16.vlgmr.msra.gmra.mxu3 %vm2085_vm12, %v2059_v12  ;;  %v2808_v1 = vpop.permute.xlu2 %2807 }
 0x1ce   : > { %v2758_v32 = vpop.permute.xlu1 %2757  ;;  %v2810_v5 = vunpack.i.h.bf16 %v2808_v1 }
 0x1cf   : > { %v2760_v57 = vunpack.i.h.bf16 %v2758_v32  ;;  %v2759_v36 = vunpack.i.l.bf16 %v2758_v32  ;;  %v2715_v32 = vunpack.i.h.bf16 %v4773_v41 }
 0x1d1   : > { %v2783_v10 = vpop.permute.xlu0 %2782  ;;  %v1986_v2 = vsel %vm1985_vm8, %v1969_v7, %v2759_v36  ;;  %v1987_v37 = vsel %vm1985_vm8, %v1970_v58, %v2760_v57  ;;  %v1980_v25 = vsel %vm1968_vm6, %v4735_v28, %v2715_v32 }
 0x1d2   : > { %v2785_v9 = vunpack.i.h.bf16 %v2783_v10  ;;  %v2784_v62 = vunpack.i.l.bf16 %v2783_v10  ;;  %v2003_v47 = vsel %vm2002_vm9, %v1986_v2, %v2769_v19  ;;  %v2004_v34 = vsel %vm2002_vm9, %v1987_v37, %v2770_v15 }
 0x1d3   : > { %v2020_v8 = vsel %vm2019_vm10, %v2003_v47, %v2779_v17  ;;  %v2021_v63 = vsel %vm2019_vm10, %v2004_v34, %v2780_v61  ;;  %v2809_v10 = vunpack.i.l.bf16 %v2808_v1 }
 0x1d5   : > { %v2823_v40 = vpop.permute.xlu2 %2822 }
 0x1d6   : > { %v2773_v55 = vpop.permute.xlu1 %2772  ;;  %v2825_v37 = vunpack.i.h.bf16 %v2823_v40 }
 0x1d7   : > { %v2775_v13 = vunpack.i.h.bf16 %v2773_v55  ;;  %v2774_v16 = vunpack.i.l.bf16 %v2773_v55 }
 0x1d9   : > { %v2007_v54 = vsel %vm2002_vm9, %v1990_v22, %v2774_v16  ;;  %v2008_v44 = vsel %vm2002_vm9, %v1991_v23, %v2775_v13  ;;  %v2798_v39 = vpop.permute.xlu0 %2797 }
 0x1da   : > { %v2024_v49 = vsel %vm2019_vm10, %v2007_v54, %v2784_v62  ;;  %v2025_v11 = vsel %vm2019_vm10, %v2008_v44, %v2785_v9  ;;  %v2800_v50 = vunpack.i.h.bf16 %v2798_v39  ;;  %v2799_v31 = vunpack.i.l.bf16 %v2798_v39 }
 0x1db   : > { %v2041_v59 = vsel %vm2036_vm11, %v2024_v49, %v2794_v60  ;;  %v2042_v38 = vsel %vm2036_vm11, %v2025_v11, %v2795_v52 }
 0x1dc   : > { %v2055_v43 = vpack.c.bf16 %v2042_v38, %v2041_v59  ;;  %v1983_v33 = vsel %vm1968_vm6, %v4724_v24, %v2799_v31  ;;  %v1984_v48 = vsel %vm1968_vm6, %v4727_v35, %v2800_v50 }
 0x1dd   : > { %v2838_v30 = vpop.permute.xlu2 %2837  ;;  %v2000_v41 = vsel %vm1985_vm8, %v1983_v33, %v2809_v10  ;;  %v2001_v24 = vsel %vm1985_vm8, %v1984_v48, %v2810_v5 }
 0x1de   : > { %v2788_v42 = vpop.permute.xlu1 %2787  ;;  %2353 = vmatmul.msk.bf16.vlgmr.msra.gmra.mxu1 %vm2085_vm12, %v2055_v43  ;;  %v2840_v58 = vunpack.i.h.bf16 %v2838_v30  ;;  %v2839_v7 = vunpack.i.l.bf16 %v2838_v30 }
 0x1df   : > { %v2790_v26 = vunpack.i.h.bf16 %v2788_v42  ;;  %v2789_v0 = vunpack.i.l.bf16 %v2788_v42 }
 0x1e1   : > { %v2037_v3 = vsel %vm2036_vm11, %v2020_v8, %v2789_v0  ;;  %v2038_v46 = vsel %vm2036_vm11, %v2021_v63, %v2790_v26  ;;  %v2813_v6 = vpop.permute.xlu0 %2812 }
 0x1e2   : > { %v2053_v21 = vpack.c.bf16 %v2038_v46, %v2037_v3  ;;  %v2815_v62 = vunpack.i.h.bf16 %v2813_v6  ;;  %v2814_v52 = vunpack.i.l.bf16 %v2813_v6 }
 0x1e4   : > { %2351 = vmatmul.msk.bf16.vlgmr.msra.gmra.mxu0 %vm2085_vm12, %v2053_v21 }
 0x1e5   : > { %v2853_v61 = vpop.permute.xlu2 %2852 }
 0x1e6   : > { %v2803_v53 = vpop.permute.xlu1 %2802  ;;  %v2855_v63 = vunpack.i.h.bf16 %v2853_v61  ;;  %v2854_v3 = vunpack.i.l.bf16 %v2853_v61 }
 0x1e7   : > { %v2805_v18 = vunpack.i.h.bf16 %v2803_v53  ;;  %v2804_v27 = vunpack.i.l.bf16 %v2803_v53 }
 0x1e9   : > { %v2828_v12 = vpop.permute.xlu0 %2827  ;;  %v1996_v16 = vsel %vm1985_vm8, %v4753_v20, %v2804_v27  ;;  %v1997_v22 = vsel %vm1985_vm8, %v1980_v25, %v2805_v18  ;;  %v2824_v20 = vunpack.i.l.bf16 %v2823_v40 }
 0x1ea   : > { %v2830_v36 = vunpack.i.h.bf16 %v2828_v12  ;;  %v2829_v55 = vunpack.i.l.bf16 %v2828_v12  ;;  %v2013_v1 = vsel %vm2002_vm9, %v1996_v16, %v2814_v52  ;;  %v2014_v2 = vsel %vm2002_vm9, %v1997_v22, %v2815_v62 }
 0x1eb   : > { %v2030_v15 = vsel %vm2019_vm10, %v2013_v1, %v2824_v20  ;;  %v2031_v19 = vsel %vm2019_vm10, %v2014_v2, %v2825_v37 }
 0x1ed   : > { %v2868_v30 = vpop.permute.xlu2 %2867 }
 0x1ee   : > { %v2818_v4 = vpop.permute.xlu1 %2817 }
 0x1ef   : > { %v2820_v56 = vunpack.i.h.bf16 %v2818_v4  ;;  %v2819_v57 = vunpack.i.l.bf16 %v2818_v4 }
 0x1f1   : > { %v2017_v35 = vsel %vm2002_vm9, %v2000_v41, %v2819_v57  ;;  %v2018_v13 = vsel %vm2002_vm9, %v2001_v24, %v2820_v56  ;;  %v2843_v28 = vpop.permute.xlu0 %2842  ;;  %v2869_v57 = vunpack.i.l.bf16 %v2868_v30 }
 0x1f2   : > { %v2034_v23 = vsel %vm2019_vm10, %v2017_v35, %v2829_v55  ;;  %v2035_v9 = vsel %vm2019_vm10, %v2018_v13, %v2830_v36  ;;  %v2845_v17 = vunpack.i.h.bf16 %v2843_v28  ;;  %v2844_v42 = vunpack.i.l.bf16 %v2843_v28  ;;  %v4917_v13 = vld [vmem:[%s5004_s2] ss:$0 sm:$0xff] }
 0x1f3   : > { %v2051_v60 = vsel %vm2036_vm11, %v2034_v23, %v2839_v7  ;;  %v2052_v54 = vsel %vm2036_vm11, %v2035_v9, %v2840_v58 }
 0x1f4   : > { %v2060_v44 = vpack.c.bf16 %v2052_v54, %v2051_v60  ;;  %v1988_v26 = vsel %vm1985_vm8, %v4696_v14, %v2844_v42  ;;  %v1989_v0 = vsel %vm1985_vm8, %v4693_v45, %v2845_v17 }
 0x1f5   : > { %v2005_v12 = vsel %vm2002_vm9, %v1988_v26, %v2854_v3  ;;  %v2006_v32 = vsel %vm2002_vm9, %v1989_v0, %v2855_v63 }
 0x1f6   : > { %v2833_v39 = vpop.permute.xlu1 %2832  ;;  %2358 = vmatmul.msk.bf16.gmra.mxu3 %vm2085_vm12, %v2060_v44 }
 0x1f7   : > { %v2835_v49 = vunpack.i.h.bf16 %v2833_v39  ;;  %v2834_v11 = vunpack.i.l.bf16 %v2833_v39 }
 0x1f9   : > { %v2047_v59 = vsel %vm2036_vm11, %v2030_v15, %v2834_v11  ;;  %v2048_v38 = vsel %vm2036_vm11, %v2031_v19, %v2835_v49  ;;  %v2858_v47 = vpop.permute.xlu0 %2857 }
 0x1fa   : > { %v2058_v43 = vpack.c.bf16 %v2048_v38, %v2047_v59  ;;  %v2860_v18 = vunpack.i.h.bf16 %v2858_v47  ;;  %v2859_v27 = vunpack.i.l.bf16 %v2858_v47 }
 0x1fc   : > { %2356 = vmatmul.msk.bf16.gmra.mxu2 %vm2085_vm12, %v2058_v43 }
 0x1fe   : > { %v2848_v34 = vpop.permute.xlu1 %2847 }
 0x1ff   : > { %v2850_v46 = vunpack.i.h.bf16 %v2848_v34  ;;  %v2849_v6 = vunpack.i.l.bf16 %v2848_v34 }
 0x201   : > { %v2873_v8 = vpop.permute.xlu0 %2872  ;;  %v1992_v45 = vsel %vm1985_vm8, %v4761_v29, %v2849_v6  ;;  %v1993_v48 = vsel %vm1985_vm8, %v4757_v51, %v2850_v46  ;;  %v2870_v29 = vunpack.i.h.bf16 %v2868_v30 }
 0x202   : > { %v2875_v50 = vunpack.i.h.bf16 %v2873_v8  ;;  %v2874_v31 = vunpack.i.l.bf16 %v2873_v8  ;;  %v2009_v25 = vsel %vm2002_vm9, %v1992_v45, %v2859_v27  ;;  %v2010_v56 = vsel %vm2002_vm9, %v1993_v48, %v2860_v18 }
 0x203   : > { %v2026_v41 = vsel %vm2019_vm10, %v2009_v25, %v2869_v57  ;;  %v2027_v24 = vsel %vm2019_vm10, %v2010_v56, %v2870_v29 }
 0x206   : > { %v2863_v21 = vpop.permute.xlu1 %2862 }
 0x207   : > { %v2865_v40 = vunpack.i.h.bf16 %v2863_v21  ;;  %v2864_v53 = vunpack.i.l.bf16 %v2863_v21 }
 0x209   : > { %v2022_v33 = vsel %vm2019_vm10, %v2005_v12, %v2864_v53  ;;  %v2023_v14 = vsel %vm2019_vm10, %v2006_v32, %v2865_v40 }
 0x20a   : > { %v2039_v5 = vsel %vm2036_vm11, %v2022_v33, %v2874_v31  ;;  %v2040_v10 = vsel %vm2036_vm11, %v2023_v14, %v2875_v50 }
 0x20b   : > { %v2054_v4 = vpack.c.bf16 %v2040_v10, %v2039_v5 }
 0x20d   : > { %2352 = vmatmul.msk.bf16.gmra.mxu0 %vm2085_vm12, %v2054_v4 }
 0x20e   : > { %v2878_v36 = vpop.permute.xlu1 %2877 }
 0x20f   : > { %v2880_v51 = vunpack.i.h.bf16 %v2878_v36  ;;  %v2879_v55 = vunpack.i.l.bf16 %v2878_v36 }
 0x211   : > { %v2043_v58 = vsel %vm2036_vm11, %v2026_v41, %v2879_v55  ;;  %v2044_v7 = vsel %vm2036_vm11, %v2027_v24, %v2880_v51 }
 0x212   : > { %v2056_v35 = vpack.c.bf16 %v2044_v7, %v2043_v58 }
 0x214   : > { %2354 = vmatmul.msk.bf16.gmra.mxu1 %vm2085_vm12, %v2056_v35 }
 0x249   : > { %v2143_v16 = vpop.f32.mrf.mxu2 }
 0x24a   : > { %v2144_v22 = vadd.f32 %v4917_v13, %v2143_v16 }
 0x24c   : > { %v2171_v28 = vmax.f32 %v2144_v22, 0.0 }
 0x24e   : > { %2187 = vst [vmem:[%s4922_s22 + $0x40] sm:$0xff] %v2171_v28 }
 0x250   : > { %v2153_v23 = vpop.f32.mrf.mxu3 }
 0x251   : > { %v2154_v9 = vadd.f32 %v4917_v13, %v2153_v23  ;;  %v2145_v62 = vpop.f32.mrf.mxu2 }
 0x252   : > { %v2146_v52 = vadd.f32 %v4917_v13, %v2145_v62 }
 0x253   : > { %v2175_v60 = vmax.f32 %v2154_v9, 0.0 }
 0x254   : > { %v2172_v54 = vmax.f32 %v2146_v52, 0.0 }
 0x255   : > { %2191 = vst [vmem:[%s4922_s22 + $0x60] sm:$0xff] %v2175_v60 }
 0x256   : > { %2188 = vst [vmem:[%s4922_s22 + $0x48] sm:$0xff] %v2172_v54 }
 0x258   : > { %v2155_v44 = vpop.f32.mrf.mxu3 }
 0x259   : > { %v2156_v1 = vadd.f32 %v4917_v13, %v2155_v44 }
 0x25b   : > { %v2176_v2 = vmax.f32 %v2156_v1, 0.0  ;;  %v2133_v37 = vpop.f32.mrf.mxu1 }
 0x25c   : > { %v2134_v20 = vadd.f32 %v4917_v13, %v2133_v37 }
 0x25d   : > { %2192 = vst [vmem:[%s4922_s22 + $0x68] sm:$0xff] %v2176_v2 }
 0x25e   : > { %v2167_v39 = vmax.f32 %v2134_v20, 0.0 }
 0x260   : > { %2183 = vst [vmem:[%s4922_s22 + $0x20] sm:$0xff] %v2167_v39 }
 0x261   : > { %v2123_v49 = vpop.f32.mrf.mxu0 }
 0x262   : > { %v2124_v11 = vadd.f32 %v4917_v13, %v2123_v49 }
 0x263   : > { %v2135_v15 = vpop.f32.mrf.mxu1 }
 0x264   : > { %v2163_v19 = vmax.f32 %v2124_v11, 0.0  ;;  %v2136_v59 = vadd.f32 %v4917_v13, %v2135_v15 }
 0x266   : > { %2179 = vst [vmem:[%s4922_s22] sm:$0xff] %v2163_v19  ;;  %v2168_v38 = vmax.f32 %v2136_v59, 0.0 }
 0x268   : > { %2184 = vst [vmem:[%s4922_s22 + $0x28] sm:$0xff] %v2168_v38 }
 0x269   : > { %v2125_v43 = vpop.f32.mrf.mxu0 }
 0x26a   : > { %v2126_v47 = vadd.f32 %v4917_v13, %v2125_v43 }
 0x26c   : > { %v2164_v34 = vmax.f32 %v2126_v47, 0.0 }
 0x26e   : > { %2180 = vst [vmem:[%s4922_s22 + $0x8] sm:$0xff] %v2164_v34 }
 0x279   : > { %v2158_v61 = vpop.f32.mrf.mxu3 }
 0x27a   : > { %v2159_v17 = vadd.f32 %v4917_v13, %v2158_v61 }
 0x27c   : > { %v2177_v42 = vmax.f32 %v2159_v17, 0.0 }
 0x27e   : > { %2193 = vst [vmem:[%s4922_s22 + $0x70] sm:$0xff] %v2177_v42 }
 0x27f   : > { %v2148_v26 = vpop.f32.mrf.mxu2 }
 0x280   : > { %v2149_v0 = vadd.f32 %v4917_v13, %v2148_v26 }
 0x281   : > { %v2160_v8 = vpop.f32.mrf.mxu3 }
 0x282   : > { %v2173_v63 = vmax.f32 %v2149_v0, 0.0  ;;  %v2161_v3 = vadd.f32 %v4917_v13, %v2160_v8 }
 0x284   : > { %2189 = vst [vmem:[%s4922_s22 + $0x50] sm:$0xff] %v2173_v63  ;;  %v2178_v46 = vmax.f32 %v2161_v3, 0.0 }
 0x286   : > { %2194 = vst [vmem:[%s4922_s22 + $0x78] sm:$0xff] %v2178_v46 }
 0x287   : > { %v2150_v6 = vpop.f32.mrf.mxu2 }
 0x288   : > { %v2151_v21 = vadd.f32 %v4917_v13, %v2150_v6 }
 0x28a   : > { %v2174_v40 = vmax.f32 %v2151_v21, 0.0  ;;  %v2128_v53 = vpop.f32.mrf.mxu0 }
 0x28b   : > { %v2129_v50 = vadd.f32 %v4917_v13, %v2128_v53 }
 0x28c   : > { %2190 = vst [vmem:[%s4922_s22 + $0x58] sm:$0xff] %v2174_v40 }
 0x28d   : > { %v2165_v31 = vmax.f32 %v2129_v50, 0.0 }
 0x28f   : > { %2181 = vst [vmem:[%s4922_s22 + $0x10] sm:$0xff] %v2165_v31 }
 0x291   : > { %v2138_v12 = vpop.f32.mrf.mxu1 }
 0x292   : > { %v2139_v32 = vadd.f32 %v4917_v13, %v2138_v12  ;;  %v2130_v33 = vpop.f32.mrf.mxu0 }
 0x293   : > { %v2131_v14 = vadd.f32 %v4917_v13, %v2130_v33 }
 0x294   : > { %v2169_v45 = vmax.f32 %v2139_v32, 0.0 }
 0x295   : > { %v2166_v48 = vmax.f32 %v2131_v14, 0.0 }
 0x296   : > { %2185 = vst [vmem:[%s4922_s22 + $0x30] sm:$0xff] %v2169_v45 }
 0x297   : > { %2182 = vst [vmem:[%s4922_s22 + $0x18] sm:$0xff] %v2166_v48 }
 0x299   : > { %v2140_v5 = vpop.f32.mrf.mxu1 }
 0x29a   : > { %v2141_v10 = vadd.f32 %v4917_v13, %v2140_v5 }
 0x29c   : > { %v2170_v30 = vmax.f32 %v2141_v10, 0.0 }
 0x29e   : > { %2186 = vst [vmem:[%s4922_s22 + $0x38] sm:$0xff] %v2170_v30 }
 0x29f   : > { %2909 = shalt.err (!%p2906_p6)
}
 0x2a0   : > { %s3005_s8 = smov 128  }
 0x2a1   : > { %2377 = dma.vmem_to_hbm [thread:$0]  (%p3077_p3), %s2212_s16, 2048, %s2214_s29, %s2196_s4, %s3005_s8, %s3005_s8, %s2999_s23  }
 0x2a2 PF: > { %p2383_p7 = scmp.ge.s32.totalorder %s2976_s19, 2  ;;  %s2228_s22 = sand.u32 1, %s2948_s12  }
 0x2a3   : > { %s2229_s20 = scalar_lea.sflag [#allocation3], %s2228_s22 }
 0x2a4   : > { %p2380_p9 = pnand %p2383_p7, %p3086_p8 }
 0x2a6   : > { %p2381_p10 = pneg %p2380_p9 }
 0x2a8   : > { %2943 = dma.done.wait (%p2381_p10), %s2229_s20, 2048  }
 0x2a9   : > { %2945 = vsyncadd (%p2381_p10), %s2229_s20, 4294965248  ;;  %s16_s19 = sadd.s32 1, %s2976_s19   ;;  %s5154_s25 = sld [smem:[#allocation5_spill]] }
 0x2aa   : > { %p13_p11 = scmp.ge.s32.totalorder %s16_s19, 6   ;;  %s5155_s23 = sld [smem:[#allocation6_spill]] }
 0x2ab   : > { %s5156_s12 = smov %s2952_s13  ;;  %s5157_s13 = smov %s2956_s14 }
 0x2ac   : > { %s5158_s14 = smov %s3095_s30  ;;  %s5159_s15 = smov %s2968_s17 }
 0x2ad   : > { %s5160_s16 = smov %s2972_s18  ;;  %15 = sbr.rel (!%p13_p11) target bundleno = 7 (0x7), region = 76 }
 0x2af   : > { %s5161_s17 = smov %s5154_s25 }
 0x2b0   : > { %s5162_s18 = smov %s5155_s23 }
 0x2b2   :  { %2235 = vsyncpa [#allocation3], 1 }
 0x2b3   :  { %2237 = vsyncpa [#allocation3 + $0x1], 1 }

</bundles_post_ra>
